<compile_context>
chip_gen: v7x
topology: tpu7x:2x2x1
jax: 0.10.0
libtpu: 0.0.40
codegen_flags: <defaults>
</compile_context>

<pallas_src>
import math
import jax
import jax.numpy as jnp
from jax.experimental import pallas as pl
from jax.experimental.pallas import tpu as pltpu

# ----------------------- small BERT config (synthetic) -----------------------
VOCAB       = 100
HIDDEN      = 32
NUM_LAYERS  = 2
NUM_HEADS   = 2
HEAD_DIM    = HIDDEN // NUM_HEADS
INTER       = 64
MAX_POS     = 32
TYPE_VOCAB  = 2
NUM_LABELS  = 2
LN_EPS      = 1e-12
LOGIT_PAD   = 128                       # lane-dense classifier output width
POOL_PAD    = 8                         # sublane-dense classifier output rows
EMB_ROWS    = VOCAB + MAX_POS + TYPE_VOCAB
EXACT_SOFTMAX = False                   # True -> exact divide (validation path)


# ------------------------------ in-kernel helpers -----------------------------
def _layernorm(x, g, b, eps=LN_EPS):
    mu = jnp.mean(x, axis=-1, keepdims=True)
    var = jnp.mean((x - mu) ** 2, axis=-1, keepdims=True)
    return (x - mu) * jax.lax.rsqrt(var + eps) * g + b


def _gelu(x):
    # exact erf-based GELU (matches torch.nn.GELU() default)
    return 0.5 * x * (1.0 + jax.lax.erf(x * (1.0 / math.sqrt(2.0))))


# --------------------------------- fused kernel --------------------------------
def bert_fused_kernel(idx_ref, mask_ref, emb_ref,
                      wqkv_ref, bqkv_ref, wo_ref, wi_ref, bi_ref, wo2_ref, vec_ref,
                      wp_ref, wc_ref, hvec_ref, bc_ref,
                      o_ref):
    # idx_ref  : (3, B*S, 1) int32   rows: word ids / position ids / token-type ids
    # mask_ref : (B, S)      f32     additive attention bias
    # emb_ref  : (VOCAB+MAX_POS+TYPE_VOCAB, H) stacked embedding tables
    # wqkv_ref : (L, H, 3H)  columns grouped per head: [q|k|v] x head_dim per head
    # vec_ref  : (L, 6, H)   rows: [attn_out_b, ln1_g, ln1_b, ffn_out_b, ln2_g, ln2_b]
    # hvec_ref : (3, H)      rows: [emb_ln_g, emb_ln_b, pooler_b]
    # wc_ref   : (H, 128), bc_ref: (1, 128)  classifier, lane-padded
    # o_ref    : (POOL_PAD, 128)
    B, S = mask_ref.shape
    BS = B * S
    NH, DH = NUM_HEADS, HEAD_DIM
    scale = 1.0 / math.sqrt(DH)

    hvec = hvec_ref[...]                                                  # (3, H)

    # ---- embeddings: word + pos + type lookup as ONE one-hot matmul against
    #      the stacked table (exact: the three one-hot column ranges are disjoint)
    word_ids = idx_ref[0]                                                 # (BS, 1)
    pos_ids = idx_ref[1] + VOCAB
    type_ids = idx_ref[2] + (VOCAB + MAX_POS)
    cols = jax.lax.broadcasted_iota(jnp.int32, (BS, EMB_ROWS), 1)
    onehot = ((cols == word_ids) | (cols == pos_ids) | (cols == type_ids)
              ).astype(jnp.float32)                                       # (BS, EMB_ROWS)
    x = jnp.dot(onehot, emb_ref[...], preferred_element_type=jnp.float32)  # (BS, H)
    x = _layernorm(x, hvec[0:1, :], hvec[1:2, :])

    # additive attention bias replicated per head; rows ordered (head, batch)
    mask_bh = jnp.tile(mask_ref[...], (NH, 1))[:, None, :]                # (NH*B, 1, S)

    for l in range(NUM_LAYERS):                                           # static unroll
        vec_l = vec_ref[l]                                                # (6, H)

        # ---- fused QKV projection: one (BS,H)x(H,3H) MXU push
        qkv = jnp.dot(x, wqkv_ref[l], preferred_element_type=jnp.float32) + bqkv_ref[l]
        qkv3 = qkv.reshape(B, S, 3 * HIDDEN)
        # columns are grouped per head, so folding heads into the batch dim is
        # ONE concatenate of contiguous lane blocks (no odd-offset lane slices)
        qkv_bh = jnp.concatenate(
            [qkv3[:, :, h * 3 * DH:(h + 1) * 3 * DH] for h in range(NH)],
            axis=0)                                                       # (NH*B, S, 3*dh)
        q_bh = qkv_bh[:, :, 0:DH] * scale                                 # fold 1/sqrt(dh) into Q
        k_bh = qkv_bh[:, :, DH:2 * DH]
        v_bh = qkv_bh[:, :, 2 * DH:3 * DH]

        # ---- batched attention over all (head, batch) pairs at once
        scores = jnp.einsum('bqd,bkd->bqk', q_bh, k_bh,
                            preferred_element_type=jnp.float32) + mask_bh
        scores = scores - jnp.max(scores, axis=-1, keepdims=True)
        p = jnp.exp(scores)
        denom = jnp.sum(p, axis=-1, keepdims=True)
        if EXACT_SOFTMAX:
            p = p / denom
        else:
            p = p * pl.reciprocal(denom, approx=True)
        ctx_bh = jnp.einsum('bqk,bkd->bqd', p, v_bh,
                            preferred_element_type=jnp.float32)           # (NH*B, S, dh)

        # heads back onto the lane dim (standard head-major hidden layout)
        ctx = jnp.concatenate(
            [ctx_bh[h * B:(h + 1) * B] for h in range(NH)],
            axis=-1).reshape(BS, HIDDEN)

        # ---- attention output projection + residual + LayerNorm
        attn = jnp.dot(ctx, wo_ref[l], preferred_element_type=jnp.float32) + vec_l[0:1, :]
        x = _layernorm(attn + x, vec_l[1:2, :], vec_l[2:3, :])

        # ---- feed-forward block + residual + LayerNorm
        inter = _gelu(jnp.dot(x, wi_ref[l], preferred_element_type=jnp.float32)
                      + bi_ref[l])
        ffn = jnp.dot(inter, wo2_ref[l], preferred_element_type=jnp.float32) + vec_l[3:4, :]
        x = _layernorm(ffn + x, vec_l[4:5, :], vec_l[5:6, :])

    # ---- pooler (first token) + classifier head; pad rows so the single
    #      output store is fully unmasked (8 sublanes x 128 lanes)
    first = x.reshape(B, S, HIDDEN)[:, 0, :]                              # (B, H)
    rows = o_ref.shape[0]
    if rows > B:
        first = jnp.concatenate(
            [first, jnp.zeros((rows - B, HIDDEN), jnp.float32)], axis=0)  # (rows, H)
    pooled = jnp.tanh(jnp.dot(first, wp_ref[...],
                              preferred_element_type=jnp.float32) + hvec[2:3, :])
    o_ref[...] = (jnp.dot(pooled, wc_ref[...],
                          preferred_element_type=jnp.float32) + bc_ref[...])


# ---------------------------- params (pre-packed at init) ----------------------------
def init_params(key):
    ks = iter(jax.random.split(key, 32))
    H, L, NH, DH = HIDDEN, NUM_LAYERS, NUM_HEADS, HEAD_DIM

    def nrm(shape):
        return 0.02 * jax.random.normal(next(ks), shape, jnp.float32)

    # stacked [word; pos; type] embedding table
    emb_tab = jnp.concatenate([nrm((VOCAB, H)), nrm((MAX_POS, H)),
                               nrm((TYPE_VOCAB, H))], axis=0)             # (EMB_ROWS, H)

    def pack_qkv_cols(wq, wk, wv):
        # group output columns per head: [h0:(q,k,v) | h1:(q,k,v) | ...]
        blocks = []
        for h in range(NH):
            sl = slice(h * DH, (h + 1) * DH)
            blocks += [wq[:, sl], wk[:, sl], wv[:, sl]]
        return jnp.concatenate(blocks, axis=1)                            # (H, 3H)

    wqkv, wo, wi, wo2 = [], [], [], []
    for _ in range(L):
        wqkv.append(pack_qkv_cols(nrm((H, H)), nrm((H, H)), nrm((H, H))))
        wo.append(nrm((H, H)))
        wi.append(nrm((H, INTER)))
        wo2.append(nrm((INTER, H)))

    # per-layer small vectors packed: [attn_out_b, ln1_g, ln1_b, ffn_out_b, ln2_g, ln2_b]
    vec_l = jnp.stack([jnp.zeros((H,)), jnp.ones((H,)), jnp.zeros((H,)),
                       jnp.zeros((H,)), jnp.ones((H,)), jnp.zeros((H,))]).astype(jnp.float32)

    # classifier pre-padded to 128 lanes (done once here, not per forward)
    wc_pad = jnp.zeros((H, LOGIT_PAD), jnp.float32).at[:, :NUM_LABELS].set(
        nrm((H, NUM_LABELS)))
    bc_pad = jnp.zeros((1, LOGIT_PAD), jnp.float32)

    return dict(
        emb_tab=emb_tab,
        wqkv=jnp.stack(wqkv),                       # (L, H, 3H)
        bqkv=jnp.zeros((L, 1, 3 * H), jnp.float32),
        wo=jnp.stack(wo),                           # (L, H, H)
        wi=jnp.stack(wi),                           # (L, H, INTER)
        bi=jnp.zeros((L, 1, INTER), jnp.float32),
        wo2=jnp.stack(wo2),                         # (L, INTER, H)
        vec=jnp.stack([vec_l] * L),                 # (L, 6, H)
        wp=nrm((H, H)),
        wc_pad=wc_pad, bc_pad=bc_pad,
        hvec=jnp.stack([jnp.ones((H,)), jnp.zeros((H,)),
                        jnp.zeros((H,))]).astype(jnp.float32),            # (3, H)
    )


# ----------------------------------- forward -----------------------------------
@jax.jit
def bert_forward(params, input_ids, attention_mask=None, token_type_ids=None):
    B, S = input_ids.shape
    if attention_mask is None:
        attention_mask = jnp.ones_like(input_ids)
    if token_type_ids is None:
        token_type_ids = jnp.zeros_like(input_ids)

    # extended attention mask: (1 - m) * -10000, broadcast over heads/queries
    ext_mask = (1.0 - attention_mask.astype(jnp.float32)) * -10000.0      # (B, S)

    # packed integer indices (word / position / token-type), flattened (b, s)
    pos_flat = jnp.tile(jnp.arange(S, dtype=jnp.int32), (B,))
    idx = jnp.stack([input_ids.astype(jnp.int32).reshape(-1),
                     pos_flat,
                     token_type_ids.astype(jnp.int32).reshape(-1)],
                    axis=0)[:, :, None]                                   # (3, B*S, 1)

    out_rows = max(POOL_PAD, B)
    vspec = pl.BlockSpec(memory_space=pltpu.MemorySpace.VMEM)

    # single fused pallas_call; every operand is a whole-array VMEM block
    logits_pad = pl.pallas_call(
        bert_fused_kernel,
        out_shape=jax.ShapeDtypeStruct((out_rows, LOGIT_PAD), jnp.float32),
        in_specs=[vspec] * 14,
        out_specs=vspec,
    )(idx, ext_mask, params['emb_tab'],
      params['wqkv'], params['bqkv'], params['wo'], params['wi'], params['bi'],
      params['wo2'], params['vec'],
      params['wp'], params['wc_pad'], params['hvec'], params['bc_pad'])

    return logits_pad[:B, :NUM_LABELS]


# ----------------------------------- main --------------------------------------
if __name__ == "__main__":
    key = jax.random.PRNGKey(0)
    pkey, ikey = jax.random.split(key, 2)
    params = init_params(pkey)

    B, S = 2, 8
    input_ids = jax.random.randint(ikey, (B, S), 0, VOCAB, dtype=jnp.int32)
    attention_mask = jnp.ones((B, S), dtype=jnp.int32)
    token_type_ids = jnp.zeros((B, S), dtype=jnp.int32)

    logits = bert_forward(params, input_ids, attention_mask, token_type_ids)
    logits = jax.block_until_ready(logits)
    assert logits.shape == (B, NUM_LABELS)
    assert bool(jnp.all(jnp.isfinite(logits)))
    print("KERNEL_OK")
</pallas_src>

<mosaic_0001>
module attributes {stable_mosaic.version = 11 : i64} {
  func.func @bert_fused_kernel(%arg0: memref<3x16x1xi32, #tpu.memory_space<vmem>>, %arg1: memref<2x8xf32, #tpu.memory_space<vmem>>, %arg2: memref<134x32xf32, #tpu.memory_space<vmem>>, %arg3: memref<2x32x96xf32, #tpu.memory_space<vmem>>, %arg4: memref<2x1x96xf32, #tpu.memory_space<vmem>>, %arg5: memref<2x32x32xf32, #tpu.memory_space<vmem>>, %arg6: memref<2x32x64xf32, #tpu.memory_space<vmem>>, %arg7: memref<2x1x64xf32, #tpu.memory_space<vmem>>, %arg8: memref<2x64x32xf32, #tpu.memory_space<vmem>>, %arg9: memref<2x6x32xf32, #tpu.memory_space<vmem>>, %arg10: memref<32x32xf32, #tpu.memory_space<vmem>>, %arg11: memref<32x128xf32, #tpu.memory_space<vmem>>, %arg12: memref<3x32xf32, #tpu.memory_space<vmem>>, %arg13: memref<1x128xf32, #tpu.memory_space<vmem>>, %arg14: memref<8x128xf32, #tpu.memory_space<vmem>>) attributes {dimension_semantics = [], scalar_prefetch = 0 : i64, scratch_operands = 0 : i64, tpu.core_type = #tpu.core_type<tc>} {
    %c0 = arith.constant 0 : index
    %c0_0 = arith.constant 0 : index
    %0 = vector.load %arg12[%c0, %c0_0] : memref<3x32xf32, #tpu.memory_space<vmem>>, vector<3x32xf32>
    %c0_1 = arith.constant 0 : index
    %c0_2 = arith.constant 0 : index
    %c0_3 = arith.constant 0 : index
    %1 = vector.load %arg0[%c0_1, %c0_2, %c0_3] : memref<3x16x1xi32, #tpu.memory_space<vmem>>, vector<1x16x1xi32>
    %2 = vector.shape_cast %1 : vector<1x16x1xi32> to vector<16x1xi32>
    %c1 = arith.constant 1 : index
    %c0_4 = arith.constant 0 : index
    %c0_5 = arith.constant 0 : index
    %3 = vector.load %arg0[%c1, %c0_4, %c0_5] : memref<3x16x1xi32, #tpu.memory_space<vmem>>, vector<1x16x1xi32>
    %4 = vector.shape_cast %3 : vector<1x16x1xi32> to vector<16x1xi32>
    %c100_i32 = arith.constant 100 : i32
    %5 = vector.broadcast %c100_i32 : i32 to vector<16x1xi32>
    %6 = arith.addi %4, %5 : vector<16x1xi32>
    %c2 = arith.constant 2 : index
    %c0_6 = arith.constant 0 : index
    %c0_7 = arith.constant 0 : index
    %7 = vector.load %arg0[%c2, %c0_6, %c0_7] : memref<3x16x1xi32, #tpu.memory_space<vmem>>, vector<1x16x1xi32>
    %8 = vector.shape_cast %7 : vector<1x16x1xi32> to vector<16x1xi32>
    %c132_i32 = arith.constant 132 : i32
    %9 = vector.broadcast %c132_i32 : i32 to vector<16x1xi32>
    %10 = arith.addi %8, %9 : vector<16x1xi32>
    %11 = tpu.iota {dimensions = array<i32: 1>} : vector<16x134xi32>
    %12 = vector.broadcast %2 : vector<16x1xi32> to vector<16x134xi32>
    %13 = arith.cmpi eq, %11, %12 : vector<16x134xi32>
    %14 = vector.broadcast %6 : vector<16x1xi32> to vector<16x134xi32>
    %15 = arith.cmpi eq, %11, %14 : vector<16x134xi32>
    %16 = arith.ori %13, %15 : vector<16x134xi1>
    %17 = vector.broadcast %10 : vector<16x1xi32> to vector<16x134xi32>
    %18 = arith.cmpi eq, %11, %17 : vector<16x134xi32>
    %19 = arith.ori %16, %18 : vector<16x134xi1>
    %20 = arith.extui %19 : vector<16x134xi1> to vector<16x134xi32>
    %21 = arith.sitofp %20 : vector<16x134xi32> to vector<16x134xf32>
    %c0_8 = arith.constant 0 : index
    %c0_9 = arith.constant 0 : index
    %22 = vector.load %arg2[%c0_8, %c0_9] : memref<134x32xf32, #tpu.memory_space<vmem>>, vector<134x32xf32>
    %cst = arith.constant dense<0.000000e+00> : vector<16x32xf32>
    %23 = tpu.matmul %21, %22, %cst {dimension_numbers = #tpu.dot_dimension_numbers<[1], [0], [0], [1], [0, 0, 1, 1], [], []>} : vector<16x134xf32>, vector<134x32xf32>, vector<16x32xf32> -> vector<16x32xf32>
    %24 = vector.extract_strided_slice %0 {offsets = [0, 0], sizes = [1, 32], strides = [1, 1]} : vector<3x32xf32> to vector<1x32xf32>
    %25 = vector.extract_strided_slice %0 {offsets = [1, 0], sizes = [1, 32], strides = [1, 1]} : vector<3x32xf32> to vector<1x32xf32>
    %cst_10 = arith.constant dense<0.000000e+00> : vector<16xf32>
    %26 = vector.multi_reduction <add>, %23, %cst_10 [1] : vector<16x32xf32> to vector<16xf32>
    %27 = vector.shape_cast %26 : vector<16xf32> to vector<16x1xf32>
    %cst_11 = arith.constant 3.200000e+01 : f32
    %28 = vector.broadcast %cst_11 : f32 to vector<16x1xf32>
    %29 = arith.divf %27, %28 : vector<16x1xf32>
    %30 = vector.broadcast %29 : vector<16x1xf32> to vector<16x32xf32>
    %31 = arith.subf %23, %30 : vector<16x32xf32>
    %32 = arith.mulf %31, %31 : vector<16x32xf32>
    %cst_12 = arith.constant dense<0.000000e+00> : vector<16xf32>
    %33 = vector.multi_reduction <add>, %32, %cst_12 [1] : vector<16x32xf32> to vector<16xf32>
    %34 = vector.shape_cast %33 : vector<16xf32> to vector<16x1xf32>
    %cst_13 = arith.constant 3.200000e+01 : f32
    %35 = vector.broadcast %cst_13 : f32 to vector<16x1xf32>
    %36 = arith.divf %34, %35 : vector<16x1xf32>
    %37 = vector.broadcast %29 : vector<16x1xf32> to vector<16x32xf32>
    %38 = arith.subf %23, %37 : vector<16x32xf32>
    %cst_14 = arith.constant 9.99999996E-13 : f32
    %39 = vector.broadcast %cst_14 : f32 to vector<16x1xf32>
    %40 = arith.addf %36, %39 : vector<16x1xf32>
    %41 = math.rsqrt %40 : vector<16x1xf32>
    %42 = vector.broadcast %41 : vector<16x1xf32> to vector<16x32xf32>
    %43 = arith.mulf %38, %42 : vector<16x32xf32>
    %44 = vector.broadcast %24 : vector<1x32xf32> to vector<16x32xf32>
    %45 = arith.mulf %43, %44 : vector<16x32xf32>
    %46 = vector.broadcast %25 : vector<1x32xf32> to vector<16x32xf32>
    %47 = arith.addf %45, %46 : vector<16x32xf32>
    %c0_15 = arith.constant 0 : index
    %c0_16 = arith.constant 0 : index
    %48 = vector.load %arg1[%c0_15, %c0_16] : memref<2x8xf32, #tpu.memory_space<vmem>>, vector<2x8xf32>
    %49 = tpu.concatenate %48, %48 in 0 : vector<2x8xf32>, vector<2x8xf32> -> vector<4x8xf32>
    %50 = vector.shape_cast %49 : vector<4x8xf32> to vector<4x1x8xf32>
    %c0_17 = arith.constant 0 : index
    %c0_18 = arith.constant 0 : index
    %c0_19 = arith.constant 0 : index
    %51 = vector.load %arg9[%c0_17, %c0_18, %c0_19] : memref<2x6x32xf32, #tpu.memory_space<vmem>>, vector<1x6x32xf32>
    %52 = vector.shape_cast %51 : vector<1x6x32xf32> to vector<6x32xf32>
    %c0_20 = arith.constant 0 : index
    %c0_21 = arith.constant 0 : index
    %c0_22 = arith.constant 0 : index
    %53 = vector.load %arg3[%c0_20, %c0_21, %c0_22] : memref<2x32x96xf32, #tpu.memory_space<vmem>>, vector<1x32x96xf32>
    %54 = vector.shape_cast %53 : vector<1x32x96xf32> to vector<32x96xf32>
    %cst_23 = arith.constant dense<0.000000e+00> : vector<16x96xf32>
    %55 = tpu.matmul %47, %54, %cst_23 {dimension_numbers = #tpu.dot_dimension_numbers<[1], [0], [0], [1], [0, 0, 1, 1], [], []>} : vector<16x32xf32>, vector<32x96xf32>, vector<16x96xf32> -> vector<16x96xf32>
    %c0_24 = arith.constant 0 : index
    %c0_25 = arith.constant 0 : index
    %c0_26 = arith.constant 0 : index
    %56 = vector.load %arg4[%c0_24, %c0_25, %c0_26] : memref<2x1x96xf32, #tpu.memory_space<vmem>>, vector<1x1x96xf32>
    %57 = vector.shape_cast %56 : vector<1x1x96xf32> to vector<1x96xf32>
    %58 = vector.broadcast %57 : vector<1x96xf32> to vector<16x96xf32>
    %59 = arith.addf %55, %58 : vector<16x96xf32>
    %60 = vector.shape_cast %59 : vector<16x96xf32> to vector<2x8x96xf32>
    %61 = vector.extract_strided_slice %60 {offsets = [0, 0, 0], sizes = [2, 8, 48], strides = [1, 1, 1]} : vector<2x8x96xf32> to vector<2x8x48xf32>
    %62 = vector.extract_strided_slice %60 {offsets = [0, 0, 48], sizes = [2, 8, 48], strides = [1, 1, 1]} : vector<2x8x96xf32> to vector<2x8x48xf32>
    %63 = tpu.concatenate %61, %62 in 0 : vector<2x8x48xf32>, vector<2x8x48xf32> -> vector<4x8x48xf32>
    %64 = vector.extract_strided_slice %63 {offsets = [0, 0, 0], sizes = [4, 8, 16], strides = [1, 1, 1]} : vector<4x8x48xf32> to vector<4x8x16xf32>
    %cst_27 = arith.constant 2.500000e-01 : f32
    %65 = vector.broadcast %cst_27 : f32 to vector<4x8x16xf32>
    %66 = arith.mulf %64, %65 : vector<4x8x16xf32>
    %67 = vector.extract_strided_slice %63 {offsets = [0, 0, 16], sizes = [4, 8, 16], strides = [1, 1, 1]} : vector<4x8x48xf32> to vector<4x8x16xf32>
    %68 = vector.extract_strided_slice %63 {offsets = [0, 0, 32], sizes = [4, 8, 16], strides = [1, 1, 1]} : vector<4x8x48xf32> to vector<4x8x16xf32>
    "tpu.trace_start"() <{level = 10 : i32, message = "bqd,bkd->bqk"}> : () -> ()
    %cst_28 = arith.constant dense<0.000000e+00> : vector<4x8x8xf32>
    %69 = tpu.matmul %66, %67, %cst_28 {dimension_numbers = #tpu.dot_dimension_numbers<[2], [2], [1], [1], [0, 0, 0, 1, 1, 1], [0], [0]>} : vector<4x8x16xf32>, vector<4x8x16xf32>, vector<4x8x8xf32> -> vector<4x8x8xf32>
    "tpu.trace_stop"() : () -> ()
    %70 = vector.broadcast %50 : vector<4x1x8xf32> to vector<4x8x8xf32>
    %71 = arith.addf %69, %70 : vector<4x8x8xf32>
    %cst_29 = arith.constant dense<0xFF800000> : vector<4x8xf32>
    %72 = vector.multi_reduction <maximumf>, %71, %cst_29 [2] : vector<4x8x8xf32> to vector<4x8xf32>
    %73 = vector.shape_cast %72 : vector<4x8xf32> to vector<4x8x1xf32>
    %74 = vector.broadcast %73 : vector<4x8x1xf32> to vector<4x8x8xf32>
    %75 = arith.subf %71, %74 : vector<4x8x8xf32>
    %76 = math.exp %75 : vector<4x8x8xf32>
    %cst_30 = arith.constant dense<0.000000e+00> : vector<4x8xf32>
    %77 = vector.multi_reduction <add>, %76, %cst_30 [2] : vector<4x8x8xf32> to vector<4x8xf32>
    %78 = vector.shape_cast %77 : vector<4x8xf32> to vector<4x8x1xf32>
    %79 = tpu.reciprocal %78 {approx = true} : vector<4x8x1xf32> -> vector<4x8x1xf32>
    %80 = vector.broadcast %79 : vector<4x8x1xf32> to vector<4x8x8xf32>
    %81 = arith.mulf %76, %80 : vector<4x8x8xf32>
    "tpu.trace_start"() <{level = 10 : i32, message = "bqk,bkd->bqd"}> : () -> ()
    %cst_31 = arith.constant dense<0.000000e+00> : vector<4x8x16xf32>
    %82 = tpu.matmul %81, %68, %cst_31 {dimension_numbers = #tpu.dot_dimension_numbers<[2], [1], [1], [2], [0, 0, 0, 1, 1, 2], [0], [0]>} : vector<4x8x8xf32>, vector<4x8x16xf32>, vector<4x8x16xf32> -> vector<4x8x16xf32>
    "tpu.trace_stop"() : () -> ()
    %83 = vector.extract_strided_slice %82 {offsets = [0, 0, 0], sizes = [2, 8, 16], strides = [1, 1, 1]} : vector<4x8x16xf32> to vector<2x8x16xf32>
    %84 = vector.extract_strided_slice %82 {offsets = [2, 0, 0], sizes = [2, 8, 16], strides = [1, 1, 1]} : vector<4x8x16xf32> to vector<2x8x16xf32>
    %85 = tpu.concatenate %83, %84 in 2 : vector<2x8x16xf32>, vector<2x8x16xf32> -> vector<2x8x32xf32>
    %86 = vector.shape_cast %85 : vector<2x8x32xf32> to vector<16x32xf32>
    %c0_32 = arith.constant 0 : index
    %c0_33 = arith.constant 0 : index
    %c0_34 = arith.constant 0 : index
    %87 = vector.load %arg5[%c0_32, %c0_33, %c0_34] : memref<2x32x32xf32, #tpu.memory_space<vmem>>, vector<1x32x32xf32>
    %88 = vector.shape_cast %87 : vector<1x32x32xf32> to vector<32x32xf32>
    %cst_35 = arith.constant dense<0.000000e+00> : vector<16x32xf32>
    %89 = tpu.matmul %86, %88, %cst_35 {dimension_numbers = #tpu.dot_dimension_numbers<[1], [0], [0], [1], [0, 0, 1, 1], [], []>} : vector<16x32xf32>, vector<32x32xf32>, vector<16x32xf32> -> vector<16x32xf32>
    %90 = vector.extract_strided_slice %52 {offsets = [0, 0], sizes = [1, 32], strides = [1, 1]} : vector<6x32xf32> to vector<1x32xf32>
    %91 = vector.broadcast %90 : vector<1x32xf32> to vector<16x32xf32>
    %92 = arith.addf %89, %91 : vector<16x32xf32>
    %93 = arith.addf %92, %47 : vector<16x32xf32>
    %94 = vector.extract_strided_slice %52 {offsets = [1, 0], sizes = [1, 32], strides = [1, 1]} : vector<6x32xf32> to vector<1x32xf32>
    %95 = vector.extract_strided_slice %52 {offsets = [2, 0], sizes = [1, 32], strides = [1, 1]} : vector<6x32xf32> to vector<1x32xf32>
    %cst_36 = arith.constant dense<0.000000e+00> : vector<16xf32>
    %96 = vector.multi_reduction <add>, %93, %cst_36 [1] : vector<16x32xf32> to vector<16xf32>
    %97 = vector.shape_cast %96 : vector<16xf32> to vector<16x1xf32>
    %cst_37 = arith.constant 3.200000e+01 : f32
    %98 = vector.broadcast %cst_37 : f32 to vector<16x1xf32>
    %99 = arith.divf %97, %98 : vector<16x1xf32>
    %100 = vector.broadcast %99 : vector<16x1xf32> to vector<16x32xf32>
    %101 = arith.subf %93, %100 : vector<16x32xf32>
    %102 = arith.mulf %101, %101 : vector<16x32xf32>
    %cst_38 = arith.constant dense<0.000000e+00> : vector<16xf32>
    %103 = vector.multi_reduction <add>, %102, %cst_38 [1] : vector<16x32xf32> to vector<16xf32>
    %104 = vector.shape_cast %103 : vector<16xf32> to vector<16x1xf32>
    %cst_39 = arith.constant 3.200000e+01 : f32
    %105 = vector.broadcast %cst_39 : f32 to vector<16x1xf32>
    %106 = arith.divf %104, %105 : vector<16x1xf32>
    %107 = vector.broadcast %99 : vector<16x1xf32> to vector<16x32xf32>
    %108 = arith.subf %93, %107 : vector<16x32xf32>
    %cst_40 = arith.constant 9.99999996E-13 : f32
    %109 = vector.broadcast %cst_40 : f32 to vector<16x1xf32>
    %110 = arith.addf %106, %109 : vector<16x1xf32>
    %111 = math.rsqrt %110 : vector<16x1xf32>
    %112 = vector.broadcast %111 : vector<16x1xf32> to vector<16x32xf32>
    %113 = arith.mulf %108, %112 : vector<16x32xf32>
    %114 = vector.broadcast %94 : vector<1x32xf32> to vector<16x32xf32>
    %115 = arith.mulf %113, %114 : vector<16x32xf32>
    %116 = vector.broadcast %95 : vector<1x32xf32> to vector<16x32xf32>
    %117 = arith.addf %115, %116 : vector<16x32xf32>
    %c0_41 = arith.constant 0 : index
    %c0_42 = arith.constant 0 : index
    %c0_43 = arith.constant 0 : index
    %118 = vector.load %arg6[%c0_41, %c0_42, %c0_43] : memref<2x32x64xf32, #tpu.memory_space<vmem>>, vector<1x32x64xf32>
    %119 = vector.shape_cast %118 : vector<1x32x64xf32> to vector<32x64xf32>
    %cst_44 = arith.constant dense<0.000000e+00> : vector<16x64xf32>
    %120 = tpu.matmul %117, %119, %cst_44 {dimension_numbers = #tpu.dot_dimension_numbers<[1], [0], [0], [1], [0, 0, 1, 1], [], []>} : vector<16x32xf32>, vector<32x64xf32>, vector<16x64xf32> -> vector<16x64xf32>
    %c0_45 = arith.constant 0 : index
    %c0_46 = arith.constant 0 : index
    %c0_47 = arith.constant 0 : index
    %121 = vector.load %arg7[%c0_45, %c0_46, %c0_47] : memref<2x1x64xf32, #tpu.memory_space<vmem>>, vector<1x1x64xf32>
    %122 = vector.shape_cast %121 : vector<1x1x64xf32> to vector<1x64xf32>
    %123 = vector.broadcast %122 : vector<1x64xf32> to vector<16x64xf32>
    %124 = arith.addf %120, %123 : vector<16x64xf32>
    %cst_48 = arith.constant 5.000000e-01 : f32
    %125 = vector.broadcast %cst_48 : f32 to vector<16x64xf32>
    %126 = arith.mulf %125, %124 : vector<16x64xf32>
    %cst_49 = arith.constant 0.707106769 : f32
    %127 = vector.broadcast %cst_49 : f32 to vector<16x64xf32>
    %128 = arith.mulf %124, %127 : vector<16x64xf32>
    %129 = math.erf %128 : vector<16x64xf32>
    %cst_50 = arith.constant 1.000000e+00 : f32
    %130 = vector.broadcast %cst_50 : f32 to vector<16x64xf32>
    %131 = arith.addf %130, %129 : vector<16x64xf32>
    %132 = arith.mulf %126, %131 : vector<16x64xf32>
    %c0_51 = arith.constant 0 : index
    %c0_52 = arith.constant 0 : index
    %c0_53 = arith.constant 0 : index
    %133 = vector.load %arg8[%c0_51, %c0_52, %c0_53] : memref<2x64x32xf32, #tpu.memory_space<vmem>>, vector<1x64x32xf32>
    %134 = vector.shape_cast %133 : vector<1x64x32xf32> to vector<64x32xf32>
    %cst_54 = arith.constant dense<0.000000e+00> : vector<16x32xf32>
    %135 = tpu.matmul %132, %134, %cst_54 {dimension_numbers = #tpu.dot_dimension_numbers<[1], [0], [0], [1], [0, 0, 1, 1], [], []>} : vector<16x64xf32>, vector<64x32xf32>, vector<16x32xf32> -> vector<16x32xf32>
    %136 = vector.extract_strided_slice %52 {offsets = [3, 0], sizes = [1, 32], strides = [1, 1]} : vector<6x32xf32> to vector<1x32xf32>
    %137 = vector.broadcast %136 : vector<1x32xf32> to vector<16x32xf32>
    %138 = arith.addf %135, %137 : vector<16x32xf32>
    %139 = arith.addf %138, %117 : vector<16x32xf32>
    %140 = vector.extract_strided_slice %52 {offsets = [4, 0], sizes = [1, 32], strides = [1, 1]} : vector<6x32xf32> to vector<1x32xf32>
    %141 = vector.extract_strided_slice %52 {offsets = [5, 0], sizes = [1, 32], strides = [1, 1]} : vector<6x32xf32> to vector<1x32xf32>
    %cst_55 = arith.constant dense<0.000000e+00> : vector<16xf32>
    %142 = vector.multi_reduction <add>, %139, %cst_55 [1] : vector<16x32xf32> to vector<16xf32>
    %143 = vector.shape_cast %142 : vector<16xf32> to vector<16x1xf32>
    %cst_56 = arith.constant 3.200000e+01 : f32
    %144 = vector.broadcast %cst_56 : f32 to vector<16x1xf32>
    %145 = arith.divf %143, %144 : vector<16x1xf32>
    %146 = vector.broadcast %145 : vector<16x1xf32> to vector<16x32xf32>
    %147 = arith.subf %139, %146 : vector<16x32xf32>
    %148 = arith.mulf %147, %147 : vector<16x32xf32>
    %cst_57 = arith.constant dense<0.000000e+00> : vector<16xf32>
    %149 = vector.multi_reduction <add>, %148, %cst_57 [1] : vector<16x32xf32> to vector<16xf32>
    %150 = vector.shape_cast %149 : vector<16xf32> to vector<16x1xf32>
    %cst_58 = arith.constant 3.200000e+01 : f32
    %151 = vector.broadcast %cst_58 : f32 to vector<16x1xf32>
    %152 = arith.divf %150, %151 : vector<16x1xf32>
    %153 = vector.broadcast %145 : vector<16x1xf32> to vector<16x32xf32>
    %154 = arith.subf %139, %153 : vector<16x32xf32>
    %cst_59 = arith.constant 9.99999996E-13 : f32
    %155 = vector.broadcast %cst_59 : f32 to vector<16x1xf32>
    %156 = arith.addf %152, %155 : vector<16x1xf32>
    %157 = math.rsqrt %156 : vector<16x1xf32>
    %158 = vector.broadcast %157 : vector<16x1xf32> to vector<16x32xf32>
    %159 = arith.mulf %154, %158 : vector<16x32xf32>
    %160 = vector.broadcast %140 : vector<1x32xf32> to vector<16x32xf32>
    %161 = arith.mulf %159, %160 : vector<16x32xf32>
    %162 = vector.broadcast %141 : vector<1x32xf32> to vector<16x32xf32>
    %163 = arith.addf %161, %162 : vector<16x32xf32>
    %c1_60 = arith.constant 1 : index
    %c0_61 = arith.constant 0 : index
    %c0_62 = arith.constant 0 : index
    %164 = vector.load %arg9[%c1_60, %c0_61, %c0_62] : memref<2x6x32xf32, #tpu.memory_space<vmem>>, vector<1x6x32xf32>
    %165 = vector.shape_cast %164 : vector<1x6x32xf32> to vector<6x32xf32>
    %c1_63 = arith.constant 1 : index
    %c0_64 = arith.constant 0 : index
    %c0_65 = arith.constant 0 : index
    %166 = vector.load %arg3[%c1_63, %c0_64, %c0_65] : memref<2x32x96xf32, #tpu.memory_space<vmem>>, vector<1x32x96xf32>
    %167 = vector.shape_cast %166 : vector<1x32x96xf32> to vector<32x96xf32>
    %cst_66 = arith.constant dense<0.000000e+00> : vector<16x96xf32>
    %168 = tpu.matmul %163, %167, %cst_66 {dimension_numbers = #tpu.dot_dimension_numbers<[1], [0], [0], [1], [0, 0, 1, 1], [], []>} : vector<16x32xf32>, vector<32x96xf32>, vector<16x96xf32> -> vector<16x96xf32>
    %c1_67 = arith.constant 1 : index
    %c0_68 = arith.constant 0 : index
    %c0_69 = arith.constant 0 : index
    %169 = vector.load %arg4[%c1_67, %c0_68, %c0_69] : memref<2x1x96xf32, #tpu.memory_space<vmem>>, vector<1x1x96xf32>
    %170 = vector.shape_cast %169 : vector<1x1x96xf32> to vector<1x96xf32>
    %171 = vector.broadcast %170 : vector<1x96xf32> to vector<16x96xf32>
    %172 = arith.addf %168, %171 : vector<16x96xf32>
    %173 = vector.shape_cast %172 : vector<16x96xf32> to vector<2x8x96xf32>
    %174 = vector.extract_strided_slice %173 {offsets = [0, 0, 0], sizes = [2, 8, 48], strides = [1, 1, 1]} : vector<2x8x96xf32> to vector<2x8x48xf32>
    %175 = vector.extract_strided_slice %173 {offsets = [0, 0, 48], sizes = [2, 8, 48], strides = [1, 1, 1]} : vector<2x8x96xf32> to vector<2x8x48xf32>
    %176 = tpu.concatenate %174, %175 in 0 : vector<2x8x48xf32>, vector<2x8x48xf32> -> vector<4x8x48xf32>
    %177 = vector.extract_strided_slice %176 {offsets = [0, 0, 0], sizes = [4, 8, 16], strides = [1, 1, 1]} : vector<4x8x48xf32> to vector<4x8x16xf32>
    %cst_70 = arith.constant 2.500000e-01 : f32
    %178 = vector.broadcast %cst_70 : f32 to vector<4x8x16xf32>
    %179 = arith.mulf %177, %178 : vector<4x8x16xf32>
    %180 = vector.extract_strided_slice %176 {offsets = [0, 0, 16], sizes = [4, 8, 16], strides = [1, 1, 1]} : vector<4x8x48xf32> to vector<4x8x16xf32>
    %181 = vector.extract_strided_slice %176 {offsets = [0, 0, 32], sizes = [4, 8, 16], strides = [1, 1, 1]} : vector<4x8x48xf32> to vector<4x8x16xf32>
    "tpu.trace_start"() <{level = 10 : i32, message = "bqd,bkd->bqk"}> : () -> ()
    %cst_71 = arith.constant dense<0.000000e+00> : vector<4x8x8xf32>
    %182 = tpu.matmul %179, %180, %cst_71 {dimension_numbers = #tpu.dot_dimension_numbers<[2], [2], [1], [1], [0, 0, 0, 1, 1, 1], [0], [0]>} : vector<4x8x16xf32>, vector<4x8x16xf32>, vector<4x8x8xf32> -> vector<4x8x8xf32>
    "tpu.trace_stop"() : () -> ()
    %183 = vector.broadcast %50 : vector<4x1x8xf32> to vector<4x8x8xf32>
    %184 = arith.addf %182, %183 : vector<4x8x8xf32>
    %cst_72 = arith.constant dense<0xFF800000> : vector<4x8xf32>
    %185 = vector.multi_reduction <maximumf>, %184, %cst_72 [2] : vector<4x8x8xf32> to vector<4x8xf32>
    %186 = vector.shape_cast %185 : vector<4x8xf32> to vector<4x8x1xf32>
    %187 = vector.broadcast %186 : vector<4x8x1xf32> to vector<4x8x8xf32>
    %188 = arith.subf %184, %187 : vector<4x8x8xf32>
    %189 = math.exp %188 : vector<4x8x8xf32>
    %cst_73 = arith.constant dense<0.000000e+00> : vector<4x8xf32>
    %190 = vector.multi_reduction <add>, %189, %cst_73 [2] : vector<4x8x8xf32> to vector<4x8xf32>
    %191 = vector.shape_cast %190 : vector<4x8xf32> to vector<4x8x1xf32>
    %192 = tpu.reciprocal %191 {approx = true} : vector<4x8x1xf32> -> vector<4x8x1xf32>
    %193 = vector.broadcast %192 : vector<4x8x1xf32> to vector<4x8x8xf32>
    %194 = arith.mulf %189, %193 : vector<4x8x8xf32>
    "tpu.trace_start"() <{level = 10 : i32, message = "bqk,bkd->bqd"}> : () -> ()
    %cst_74 = arith.constant dense<0.000000e+00> : vector<4x8x16xf32>
    %195 = tpu.matmul %194, %181, %cst_74 {dimension_numbers = #tpu.dot_dimension_numbers<[2], [1], [1], [2], [0, 0, 0, 1, 1, 2], [0], [0]>} : vector<4x8x8xf32>, vector<4x8x16xf32>, vector<4x8x16xf32> -> vector<4x8x16xf32>
    "tpu.trace_stop"() : () -> ()
    %196 = vector.extract_strided_slice %195 {offsets = [0, 0, 0], sizes = [2, 8, 16], strides = [1, 1, 1]} : vector<4x8x16xf32> to vector<2x8x16xf32>
    %197 = vector.extract_strided_slice %195 {offsets = [2, 0, 0], sizes = [2, 8, 16], strides = [1, 1, 1]} : vector<4x8x16xf32> to vector<2x8x16xf32>
    %198 = tpu.concatenate %196, %197 in 2 : vector<2x8x16xf32>, vector<2x8x16xf32> -> vector<2x8x32xf32>
    %199 = vector.shape_cast %198 : vector<2x8x32xf32> to vector<16x32xf32>
    %c1_75 = arith.constant 1 : index
    %c0_76 = arith.constant 0 : index
    %c0_77 = arith.constant 0 : index
    %200 = vector.load %arg5[%c1_75, %c0_76, %c0_77] : memref<2x32x32xf32, #tpu.memory_space<vmem>>, vector<1x32x32xf32>
    %201 = vector.shape_cast %200 : vector<1x32x32xf32> to vector<32x32xf32>
    %cst_78 = arith.constant dense<0.000000e+00> : vector<16x32xf32>
    %202 = tpu.matmul %199, %201, %cst_78 {dimension_numbers = #tpu.dot_dimension_numbers<[1], [0], [0], [1], [0, 0, 1, 1], [], []>} : vector<16x32xf32>, vector<32x32xf32>, vector<16x32xf32> -> vector<16x32xf32>
    %203 = vector.extract_strided_slice %165 {offsets = [0, 0], sizes = [1, 32], strides = [1, 1]} : vector<6x32xf32> to vector<1x32xf32>
    %204 = vector.broadcast %203 : vector<1x32xf32> to vector<16x32xf32>
    %205 = arith.addf %202, %204 : vector<16x32xf32>
    %206 = arith.addf %205, %163 : vector<16x32xf32>
    %207 = vector.extract_strided_slice %165 {offsets = [1, 0], sizes = [1, 32], strides = [1, 1]} : vector<6x32xf32> to vector<1x32xf32>
    %208 = vector.extract_strided_slice %165 {offsets = [2, 0], sizes = [1, 32], strides = [1, 1]} : vector<6x32xf32> to vector<1x32xf32>
    %cst_79 = arith.constant dense<0.000000e+00> : vector<16xf32>
    %209 = vector.multi_reduction <add>, %206, %cst_79 [1] : vector<16x32xf32> to vector<16xf32>
    %210 = vector.shape_cast %209 : vector<16xf32> to vector<16x1xf32>
    %cst_80 = arith.constant 3.200000e+01 : f32
    %211 = vector.broadcast %cst_80 : f32 to vector<16x1xf32>
    %212 = arith.divf %210, %211 : vector<16x1xf32>
    %213 = vector.broadcast %212 : vector<16x1xf32> to vector<16x32xf32>
    %214 = arith.subf %206, %213 : vector<16x32xf32>
    %215 = arith.mulf %214, %214 : vector<16x32xf32>
    %cst_81 = arith.constant dense<0.000000e+00> : vector<16xf32>
    %216 = vector.multi_reduction <add>, %215, %cst_81 [1] : vector<16x32xf32> to vector<16xf32>
    %217 = vector.shape_cast %216 : vector<16xf32> to vector<16x1xf32>
    %cst_82 = arith.constant 3.200000e+01 : f32
    %218 = vector.broadcast %cst_82 : f32 to vector<16x1xf32>
    %219 = arith.divf %217, %218 : vector<16x1xf32>
    %220 = vector.broadcast %212 : vector<16x1xf32> to vector<16x32xf32>
    %221 = arith.subf %206, %220 : vector<16x32xf32>
    %cst_83 = arith.constant 9.99999996E-13 : f32
    %222 = vector.broadcast %cst_83 : f32 to vector<16x1xf32>
    %223 = arith.addf %219, %222 : vector<16x1xf32>
    %224 = math.rsqrt %223 : vector<16x1xf32>
    %225 = vector.broadcast %224 : vector<16x1xf32> to vector<16x32xf32>
    %226 = arith.mulf %221, %225 : vector<16x32xf32>
    %227 = vector.broadcast %207 : vector<1x32xf32> to vector<16x32xf32>
    %228 = arith.mulf %226, %227 : vector<16x32xf32>
    %229 = vector.broadcast %208 : vector<1x32xf32> to vector<16x32xf32>
    %230 = arith.addf %228, %229 : vector<16x32xf32>
    %c1_84 = arith.constant 1 : index
    %c0_85 = arith.constant 0 : index
    %c0_86 = arith.constant 0 : index
    %231 = vector.load %arg6[%c1_84, %c0_85, %c0_86] : memref<2x32x64xf32, #tpu.memory_space<vmem>>, vector<1x32x64xf32>
    %232 = vector.shape_cast %231 : vector<1x32x64xf32> to vector<32x64xf32>
    %cst_87 = arith.constant dense<0.000000e+00> : vector<16x64xf32>
    %233 = tpu.matmul %230, %232, %cst_87 {dimension_numbers = #tpu.dot_dimension_numbers<[1], [0], [0], [1], [0, 0, 1, 1], [], []>} : vector<16x32xf32>, vector<32x64xf32>, vector<16x64xf32> -> vector<16x64xf32>
    %c1_88 = arith.constant 1 : index
    %c0_89 = arith.constant 0 : index
    %c0_90 = arith.constant 0 : index
    %234 = vector.load %arg7[%c1_88, %c0_89, %c0_90] : memref<2x1x64xf32, #tpu.memory_space<vmem>>, vector<1x1x64xf32>
    %235 = vector.shape_cast %234 : vector<1x1x64xf32> to vector<1x64xf32>
    %236 = vector.broadcast %235 : vector<1x64xf32> to vector<16x64xf32>
    %237 = arith.addf %233, %236 : vector<16x64xf32>
    %cst_91 = arith.constant 5.000000e-01 : f32
    %238 = vector.broadcast %cst_91 : f32 to vector<16x64xf32>
    %239 = arith.mulf %238, %237 : vector<16x64xf32>
    %cst_92 = arith.constant 0.707106769 : f32
    %240 = vector.broadcast %cst_92 : f32 to vector<16x64xf32>
    %241 = arith.mulf %237, %240 : vector<16x64xf32>
    %242 = math.erf %241 : vector<16x64xf32>
    %cst_93 = arith.constant 1.000000e+00 : f32
    %243 = vector.broadcast %cst_93 : f32 to vector<16x64xf32>
    %244 = arith.addf %243, %242 : vector<16x64xf32>
    %245 = arith.mulf %239, %244 : vector<16x64xf32>
    %c1_94 = arith.constant 1 : index
    %c0_95 = arith.constant 0 : index
    %c0_96 = arith.constant 0 : index
    %246 = vector.load %arg8[%c1_94, %c0_95, %c0_96] : memref<2x64x32xf32, #tpu.memory_space<vmem>>, vector<1x64x32xf32>
    %247 = vector.shape_cast %246 : vector<1x64x32xf32> to vector<64x32xf32>
    %cst_97 = arith.constant dense<0.000000e+00> : vector<16x32xf32>
    %248 = tpu.matmul %245, %247, %cst_97 {dimension_numbers = #tpu.dot_dimension_numbers<[1], [0], [0], [1], [0, 0, 1, 1], [], []>} : vector<16x64xf32>, vector<64x32xf32>, vector<16x32xf32> -> vector<16x32xf32>
    %249 = vector.extract_strided_slice %165 {offsets = [3, 0], sizes = [1, 32], strides = [1, 1]} : vector<6x32xf32> to vector<1x32xf32>
    %250 = vector.broadcast %249 : vector<1x32xf32> to vector<16x32xf32>
    %251 = arith.addf %248, %250 : vector<16x32xf32>
    %252 = arith.addf %251, %230 : vector<16x32xf32>
    %253 = vector.extract_strided_slice %165 {offsets = [4, 0], sizes = [1, 32], strides = [1, 1]} : vector<6x32xf32> to vector<1x32xf32>
    %254 = vector.extract_strided_slice %165 {offsets = [5, 0], sizes = [1, 32], strides = [1, 1]} : vector<6x32xf32> to vector<1x32xf32>
    %cst_98 = arith.constant dense<0.000000e+00> : vector<16xf32>
    %255 = vector.multi_reduction <add>, %252, %cst_98 [1] : vector<16x32xf32> to vector<16xf32>
    %256 = vector.shape_cast %255 : vector<16xf32> to vector<16x1xf32>
    %cst_99 = arith.constant 3.200000e+01 : f32
    %257 = vector.broadcast %cst_99 : f32 to vector<16x1xf32>
    %258 = arith.divf %256, %257 : vector<16x1xf32>
    %259 = vector.broadcast %258 : vector<16x1xf32> to vector<16x32xf32>
    %260 = arith.subf %252, %259 : vector<16x32xf32>
    %261 = arith.mulf %260, %260 : vector<16x32xf32>
    %cst_100 = arith.constant dense<0.000000e+00> : vector<16xf32>
    %262 = vector.multi_reduction <add>, %261, %cst_100 [1] : vector<16x32xf32> to vector<16xf32>
    %263 = vector.shape_cast %262 : vector<16xf32> to vector<16x1xf32>
    %cst_101 = arith.constant 3.200000e+01 : f32
    %264 = vector.broadcast %cst_101 : f32 to vector<16x1xf32>
    %265 = arith.divf %263, %264 : vector<16x1xf32>
    %266 = vector.broadcast %258 : vector<16x1xf32> to vector<16x32xf32>
    %267 = arith.subf %252, %266 : vector<16x32xf32>
    %cst_102 = arith.constant 9.99999996E-13 : f32
    %268 = vector.broadcast %cst_102 : f32 to vector<16x1xf32>
    %269 = arith.addf %265, %268 : vector<16x1xf32>
    %270 = math.rsqrt %269 : vector<16x1xf32>
    %271 = vector.broadcast %270 : vector<16x1xf32> to vector<16x32xf32>
    %272 = arith.mulf %267, %271 : vector<16x32xf32>
    %273 = vector.broadcast %253 : vector<1x32xf32> to vector<16x32xf32>
    %274 = arith.mulf %272, %273 : vector<16x32xf32>
    %275 = vector.broadcast %254 : vector<1x32xf32> to vector<16x32xf32>
    %276 = arith.addf %274, %275 : vector<16x32xf32>
    %277 = vector.shape_cast %276 : vector<16x32xf32> to vector<2x8x32xf32>
    %278 = vector.extract_strided_slice %277 {offsets = [0, 0, 0], sizes = [2, 1, 32], strides = [1, 1, 1]} : vector<2x8x32xf32> to vector<2x1x32xf32>
    %279 = vector.shape_cast %278 : vector<2x1x32xf32> to vector<2x32xf32>
    %cst_103 = arith.constant 0.000000e+00 : f32
    %280 = vector.broadcast %cst_103 : f32 to vector<6x32xf32>
    %281 = tpu.concatenate %279, %280 in 0 : vector<2x32xf32>, vector<6x32xf32> -> vector<8x32xf32>
    %c0_104 = arith.constant 0 : index
    %c0_105 = arith.constant 0 : index
    %282 = vector.load %arg10[%c0_104, %c0_105] : memref<32x32xf32, #tpu.memory_space<vmem>>, vector<32x32xf32>
    %cst_106 = arith.constant dense<0.000000e+00> : vector<8x32xf32>
    %283 = tpu.matmul %281, %282, %cst_106 {dimension_numbers = #tpu.dot_dimension_numbers<[1], [0], [0], [1], [0, 0, 1, 1], [], []>} : vector<8x32xf32>, vector<32x32xf32>, vector<8x32xf32> -> vector<8x32xf32>
    %284 = vector.extract_strided_slice %0 {offsets = [2, 0], sizes = [1, 32], strides = [1, 1]} : vector<3x32xf32> to vector<1x32xf32>
    %285 = vector.broadcast %284 : vector<1x32xf32> to vector<8x32xf32>
    %286 = arith.addf %283, %285 : vector<8x32xf32>
    %287 = math.tanh %286 : vector<8x32xf32>
    %c0_107 = arith.constant 0 : index
    %c0_108 = arith.constant 0 : index
    %288 = vector.load %arg11[%c0_107, %c0_108] : memref<32x128xf32, #tpu.memory_space<vmem>>, vector<32x128xf32>
    %cst_109 = arith.constant dense<0.000000e+00> : vector<8x128xf32>
    %289 = tpu.matmul %287, %288, %cst_109 {dimension_numbers = #tpu.dot_dimension_numbers<[1], [0], [0], [1], [0, 0, 1, 1], [], []>} : vector<8x32xf32>, vector<32x128xf32>, vector<8x128xf32> -> vector<8x128xf32>
    %c0_110 = arith.constant 0 : index
    %c0_111 = arith.constant 0 : index
    %290 = vector.load %arg13[%c0_110, %c0_111] : memref<1x128xf32, #tpu.memory_space<vmem>>, vector<1x128xf32>
    %291 = vector.broadcast %290 : vector<1x128xf32> to vector<8x128xf32>
    %292 = arith.addf %289, %291 : vector<8x128xf32>
    %c0_112 = arith.constant 0 : index
    %c0_113 = arith.constant 0 : index
    %293 = vector.load %arg14[%c0_112, %c0_113] : memref<8x128xf32, #tpu.memory_space<vmem>>, vector<8x128xf32>
    tpu.vector_store %arg14[%c0_112, %c0_113], %292 {strides = array<i32>} : memref<8x128xf32, #tpu.memory_space<vmem>>, vector<8x128xf32>,
    return
  }
}

</mosaic_0001>

<bundles_post_ra>
// kernel: bert_forward.1
= control target key start
LH: loop header
LB: loop body
LE: loop exit
PB: predicated region body
PF: predicated region fallthrough
CT: control target
= control target key end

     0   :  { %v3339_v0 = vmov 0   ;;  %v3340_v9 = vmov 0.0|0.0   ;;  %v3341_v36 = vmov 0.0   ;;  %vm133_vm0 = vcmask 1045504   ;;  %s3344_s19 = smov 80   ;;  %s3345_s20 = smov 112   ;;  %s3969_s0 = inlined_call_operand.vmem [shape: s32[3,16,1], index: 0, kind: input, shape index: {}]   ;;  %s3970_s2 = inlined_call_operand.vmem [shape: f32[134,32], index: 2, kind: input, shape index: {}]   ;;  %s3971_s3 = inlined_call_operand.vmem [shape: f32[2,32,96], index: 3, kind: input, shape index: {}]   ;;  %s3972_s12 = inlined_call_operand.vmem [shape: f32[3,32], index: 12, kind: input, shape index: {}]   ;;  %s3973_s4 = inlined_call_operand.vmem [shape: f32[2,1,96], index: 4, kind: input, shape index: {}]   ;;  %s3974_s1 = inlined_call_operand.vmem [shape: f32[2,8], index: 1, kind: input, shape index: {}]   ;;  %s3975_s5 = inlined_call_operand.vmem [shape: f32[2,32,32], index: 5, kind: input, shape index: {}]   ;;  %s3976_s9 = inlined_call_operand.vmem [shape: f32[2,6,32], index: 9, kind: input, shape index: {}]   ;;  %s3977_s6 = inlined_call_operand.vmem [shape: f32[2,32,64], index: 6, kind: input, shape index: {}]   ;;  %s3978_s8 = inlined_call_operand.vmem [shape: f32[2,64,32], index: 8, kind: input, shape index: {}]   ;;  %s3979_s7 = inlined_call_operand.vmem [shape: f32[2,1,64], index: 7, kind: input, shape index: {}]   ;;  %s3980_s10 = inlined_call_operand.vmem [shape: f32[32,32], index: 10, kind: input, shape index: {}]   ;;  %s3981_s11 = inlined_call_operand.vmem [shape: f32[32,128], index: 11, kind: input, shape index: {}]   ;;  %s3982_s13 = inlined_call_operand.vmem [shape: f32[1,128], index: 13, kind: input, shape index: {}]   ;;  %s3983_s14 = inlined_call_operand.vmem [shape: f32[8,128], index: 14, kind: output, shape index: {}]  }
   0x1   :  { %3275 = vset.pattern.permute.xlu1 %v3339_v0  ;;  %3274 = vset.pattern.permute.xlu0 %v3339_v0  ;;  %v49_v1 = vld [vmem:[%s3969_s0 + $0x8] sm:$0xff]  ;;  %v48_v2 = vld [vmem:[%s3969_s0] sm:$0xff]  ;;  %v2761_v5 = vld [vmem:[%s3969_s0 + $0x10] sm:$0xff]  ;;  %v60_v38 = vlaneseq  ;;  %vm126_vm10 = vcmask 48128   ;;  %v3342_v48 = vmov 1.0   ;;  %s3348_s30 = smov 16  }
   0x2   :  { %v2763_v3 = vld [vmem:[%s3969_s0 + $0x20] sm:$0xff]  ;;  %67 = vperm.xlu1 %3275, %v49_v1   ;;  %64 = vperm.xlu0 %3274, %v48_v2   ;;  %v2764_v6 = vld [vmem:[%s3969_s0 + $0x28] sm:$0xff]  ;;  %v53_v7 = vadd.s32 100, %v2761_v5  ;;  %v2762_v8 = vld [vmem:[%s3969_s0 + $0x18] sm:$0xff] }
   0x3   :  { %v58_v4 = vadd.s32 132, %v2763_v3  ;;  %3148 = vmatprep.subr.bf16.mxu0 %v3340_v9  ;;  %v109_v10 = vld [vmem:[%s3970_s2] sm:$0xff]  ;;  %v110_v11 = vld [vmem:[%s3970_s2 + $0x8] sm:$0xff]  ;;  %v111_v13 = vld [vmem:[%s3970_s2 + $0x10] sm:$0xff]  ;;  %v59_v15 = vadd.s32 132, %v2764_v6  ;;  %v54_v16 = vadd.s32 100, %v2762_v8 }
   0x4   :  { %v3149_v12 = vpack.c.bf16 %v110_v11, %v109_v10  ;;  %v112_v14 = vld [vmem:[%s3970_s2 + $0x18] sm:$0xff]  ;;  %v113_v18 = vld [vmem:[%s3970_s2 + $0x20] sm:$0xff]  ;;  %v114_v19 = vld [vmem:[%s3970_s2 + $0x28] sm:$0xff]  ;;  %v61_v39 = vand.u32 127, %v60_v38 }
   0x5   :  { %v3152_v17 = vpack.c.bf16 %v112_v14, %v111_v13  ;;  %v3155_v20 = vpack.c.bf16 %v114_v19, %v113_v18  ;;  %v115_v21 = vld [vmem:[%s3970_s2 + $0x30] sm:$0xff]  ;;  %v116_v22 = vld [vmem:[%s3970_s2 + $0x38] sm:$0xff]  ;;  %v117_v24 = vld [vmem:[%s3970_s2 + $0x40] sm:$0xff]  ;;  %v3525_v14 = vshrl.u32 %v60_v38, 7 }
   0x6   :  { %88 = vperm.xlu1 %3275, %v58_v4   ;;  %74 = vperm.xlu0 %3274, %v53_v7   ;;  %v3158_v23 = vpack.c.bf16 %v116_v22, %v115_v21  ;;  %v118_v25 = vld [vmem:[%s3970_s2 + $0x48] sm:$0xff]  ;;  %v119_v27 = vld [vmem:[%s3970_s2 + $0x50] sm:$0xff]  ;;  %v120_v28 = vld [vmem:[%s3970_s2 + $0x58] sm:$0xff]  ;;  %v62_v42 = vadd.s32 128, %v61_v39 }
   0x7   :  { %3150 = vmatpush1.bf16.msra.mxu0 %v3149_v12  ;;  %v3161_v26 = vpack.c.bf16 %v118_v25, %v117_v24  ;;  %v3164_v29 = vpack.c.bf16 %v120_v28, %v119_v27  ;;  %v121_v30 = vld [vmem:[%s3970_s2 + $0x60] sm:$0xff]  ;;  %v122_v31 = vld [vmem:[%s3970_s2 + $0x68] sm:$0xff]  ;;  %v123_v33 = vld [vmem:[%s3970_s2 + $0x70] sm:$0xff]  ;;  %v3534_v18 = vsub.s32 1, %v3525_v14 }
   0x8   :  { %3151 = vmatprep.subr.bf16.mxu0 %v3340_v9  ;;  %v3167_v32 = vpack.c.bf16 %v122_v31, %v121_v30  ;;  %v124_v34 = vld [vmem:[%s3970_s2 + $0x78] sm:$0xff]  ;;  %v125_v37 = vld [vmem:[%s3970_s2 + $0x80] sm:$0x3f]  ;;  %v285_v3 = vld [vmem:[%s3971_s3 + $0x8] sm:$0xff] }
   0x9   :  { %v3170_v35 = vpack.c.bf16 %v124_v34, %v123_v33  ;;  %v284_v2 = vld [vmem:[%s3971_s3] sm:$0xff]  ;;  %v286_v4 = vld [vmem:[%s3971_s3 + $0x10] sm:$0xff]  ;;  %v287_v6 = vld [vmem:[%s3971_s3 + $0x18] sm:$0xff] }
   0xa   :  { %91 = vperm.xlu1 %3275, %v59_v15   ;;  %77 = vperm.xlu0 %3274, %v54_v16   ;;  %v3172_v5 = vpack.c.bf16 %v285_v3, %v284_v2  ;;  %v3176_v7 = vpack.c.bf16 %v287_v6, %v286_v4  ;;  %v3528_v16 = vsub.s32 0, %v3525_v14 }
   0xb   :  { %3153 = vmatpush1.bf16.msra.mxu0 %v3152_v17  ;;  %v47_v17 = vld [vmem:[%s3972_s12] sm:$0x7] }
   0xc   :  { %3154 = vmatprep.subr.bf16.mxu0 %v3340_v9  ;;  %3173 = vmatprep.subr.bf16.mxu1 %v3172_v5  ;;  %v243_v19 = vrot.slane %v47_v17, %v3528_v16  ;;  %v249_v22 = vrot.slane %v47_v17, %v3534_v18 }
   0xd   :  { %3175 = vmatpush3.bf16.msra.mxu1 %v3172_v5 }
   0xe   :  { %3177 = vmatprep.subr.bf16.mxu1 %v3176_v7 }
   0xf   :  { %3156 = vmatpush1.bf16.msra.mxu0 %v3155_v20 }
  0x10   :  { %3157 = vmatprep.subr.bf16.mxu0 %v3340_v9 }
  0x11   :  { %3179 = vmatpush3.bf16.msra.mxu1 %v3176_v7 }
  0x12   :  { %2953 = vmatprep.subr.mxu1 %v3341_v36 }
  0x13   :  { %3159 = vmatpush1.bf16.msra.mxu0 %v3158_v23 }
  0x14   :  { %3160 = vmatprep.subr.bf16.mxu0 %v3340_v9 }
  0x17   :  { %3162 = vmatpush1.bf16.msra.mxu0 %v3161_v26 }
  0x18   :  { %3163 = vmatprep.subr.bf16.mxu0 %v3340_v9 }
  0x1b   :  { %3165 = vmatpush1.bf16.msra.mxu0 %v3164_v29  ;;  %v2774_v29 = vld [vmem:[%s3973_s4] ss:$0 sm:$0xff] }
  0x1c   :  { %3166 = vmatprep.subr.bf16.mxu0 %v3340_v9 }
  0x1f   :  { %3168 = vmatpush1.bf16.msra.mxu0 %v3167_v32 }
  0x20   :  { %3169 = vmatprep.subr.bf16.mxu0 %v3340_v9 }
  0x23   :  { %3171 = vmatpush1.bf16.msra.mxu0 %v3170_v35 }
  0x24   :  { %169 = vmatprep.subr.mxu0 %v3341_v36 }
  0x27   :  { %2769 = vmatpush1.msk.msra.mxu0 %vm133_vm0, %v125_v37 }
  0x81   :  { %v68_v40 = vpop.permute.xlu1 %67  ;;  %v65_v41 = vpop.permute.xlu0 %64 }
  0x82   :  { %vm69_vm1 = vcmp.eq.s32.totalorder %v61_v39, %v65_v41  ;;  %vm70_vm5 = vcmp.eq.s32.totalorder %v62_v42, %v65_v41  ;;  %vm71_vm11 = vcmp.eq.s32.totalorder %v61_v39, %v68_v40  ;;  %vm72_vm0 = vcmp.eq.s32.totalorder %v62_v42, %v68_v40 }
  0x85   :  { %v89_v43 = vpop.permute.xlu1 %88  ;;  %v75_v44 = vpop.permute.xlu0 %74 }
  0x86   :  { %vm94_vm2 = vcmp.eq.s32.totalorder %v62_v42, %v89_v43  ;;  %vm79_vm3 = vcmp.eq.s32.totalorder %v61_v39, %v75_v44  ;;  %vm80_vm4 = vcmp.eq.s32.totalorder %v62_v42, %v75_v44  ;;  %vm93_vm6 = vcmp.eq.s32.totalorder %v61_v39, %v89_v43 }
  0x87   :  { %vm83_vm7 = vmor %vm69_vm1, %vm79_vm3 }
  0x88   :  { %vm84_vm8 = vmor %vm70_vm5, %vm80_vm4 }
  0x89   :  { %v92_v45 = vpop.permute.xlu1 %91  ;;  %v78_v46 = vpop.permute.xlu0 %77  ;;  %vm98_vm9 = vmor %vm84_vm8, %vm94_vm2  ;;  %vm212_vm8 = vcmask 261120  }
  0x8a   :  { %vm96_vm12 = vcmp.eq.s32.totalorder %v62_v42, %v92_v45  ;;  %vm81_vm13 = vcmp.eq.s32.totalorder %v61_v39, %v78_v46  ;;  %vm82_vm14 = vcmp.eq.s32.totalorder %v62_v42, %v78_v46  ;;  %vm97_vm15 = vmor %vm83_vm7, %vm93_vm6  ;;  %v2766_v47 = vsel %vm98_vm9, 1.0, %v3341_v36 }
  0x8b   :  { %vm85_vm1 = vmor %vm71_vm11, %vm81_vm13  ;;  %2770 = vmatprep.mubr.msk.f32.mxu0 %vm126_vm10, %v2766_v47  ;;  %vm95_vm4 = vcmp.eq.s32.totalorder %v61_v39, %v92_v45  ;;  %vm3343_vm6 = vmmov 0   ;;  %vm410_vm7 = vcmask 130048   ;;  %v3346_v45 = vmov 1966171168   ;;  %v252_v47 = vld [vmem:[%s3974_s1] sm:$0x3] }
  0x8c   :  { %vm86_vm3 = vmor %vm72_vm0, %vm82_vm14  ;;  %2771 = vmatmul.mubr.msk.f32.vlgmr.msra.gmra.mrb[0].mxu0 %vm97_vm15, %v3342_v48  ;;  %v260_v46 = vunpack.c.l.s4 %v3346_v45  ;;  %vm256_vm9 = vcmask 1041408   ;;  %s3347_s1 = smov 96   ;;  %vm1319_vm11 = vcmask 523264  }
  0x8d   :  { %vm100_vm5 = vmor %vm86_vm3, %vm96_vm12  ;;  %vm2586_vm12 = vcmask 1041409  }
  0x8e   :  { %v2768_v49 = vsel %vm100_vm5, 1.0, %v3341_v36  ;;  %vm99_vm2 = vmor %vm85_vm1, %vm95_vm4 }
  0x8f   :  { %2772 = vmatprep.mubr.msk.f32.mxu0 %vm126_vm10, %v2768_v49  ;;  %v254_v49 = vrot.slane %v252_v47, 6  ;;  %vm717_vm10 = vcmask 64512  }
  0x90   :  { %2773 = vmatmul.mubr.msk.f32.gmra.mrb[2].mxu0 %vm99_vm2, %v3342_v48  ;;  %v261_v48 = vunpack.c.0.s8 %v260_v46 }
 0x15f   :  { %v203_v50 = vpop.f32.mrb[0].mxu0 }
 0x160   :  { %v205_v51 = vpop.f32.mrb[1].mxu0  ;;  %v213_v52 = vsel %vm212_vm8, %v203_v50, 0.0 }
 0x161   :  { %214 = vadd.xlane.f32.xlu0 %v213_v52  ;;  %v257_v51 = vsel %vm256_vm9, %v252_v47, %v254_v49 }
 0x163   :  { %v208_v53 = vpop.f32.mrb[2].mxu0 }
 0x164   :  { %v210_v54 = vpop.f32.mrb[3].mxu0  ;;  %v216_v55 = vsel %vm212_vm8, %v208_v53, 0.0 }
 0x165   :  { %217 = vadd.xlane.f32.xlu1 %v216_v55 }
 0x1ee   :  { %v215_v56 = vpop.xlane.xlu0 %214 }
 0x1ef   :  { %v220_v57 = vmul.f32 0.03125, %v215_v56 }
 0x1f1   :  { %v222_v58 = vsub.f32 %v203_v50, %v220_v57  ;;  %v264_v50 = vsub.s32 %v261_v48, %v3525_v14 }
 0x1f2   :  { %v218_v59 = vpop.xlane.xlu1 %217 }
 0x1f3   :  { %v221_v60 = vmul.f32 0.03125, %v218_v59  ;;  %v224_v61 = vmul.f32 %v222_v58, %v222_v58  ;;  %v265_v52 = vrot.slane %v257_v51, %v264_v50 }
 0x1f5   :  { %v223_v62 = vsub.f32 %v208_v53, %v221_v60  ;;  %v226_v63 = vsel %vm212_vm8, %v224_v61, 0.0  ;;  %v273_v53 = vrot.slane %v265_v52, %v264_v50  ;;  %v266_v54 = vcombine.high %v265_v52, %v265_v52 }
 0x1f6   :  { %227 = vadd.xlane.f32.xlu0 %v226_v63 }
 0x1f7   :  { %v225_v0 = vmul.f32 %v223_v62, %v223_v62  ;;  %v3596_v55 = vrot.slane %v273_v53, %v3528_v16  ;;  %v280_v56 = vrot.slane %v266_v54, %v264_v50  ;;  %v281_v2 = vcombine.high %v273_v53, %v273_v53 }
 0x1f9   :  { %v229_v1 = vsel %vm212_vm8, %v225_v0, 0.0  ;;  %v3600_v60 = vrot.slane %v280_v56, %v3528_v16  ;;  %v3607_v3 = vrot.slane %v281_v2, %v3528_v16  ;;  %v282_v4 = vcombine.high %v280_v56, %v280_v56 }
 0x1fa   :  { %230 = vadd.xlane.f32.xlu0 %v229_v1 }
 0x283   :  { %v228_v8 = vpop.xlane.xlu0 %227 }
 0x284   :  { %v232_v10 = vmul.f32 0.03125, %v228_v8  ;;  %v3611_v8 = vrot.slane %v282_v4, %v3528_v16 }
 0x286   :  { %v234_v11 = vadd.f32 1e-12, %v232_v10 }
 0x287   :  { %v231_v12 = vpop.xlane.xlu0 %230 }
 0x288   :  { %3276 = vrsqrt.f32 %v234_v11  ;;  %v233_v13 = vmul.f32 0.03125, %v231_v12 }
 0x28a   :  { %v235_v15 = vadd.f32 1e-12, %v233_v13 }
 0x28c   :  { %3278 = vrsqrt.f32 %v235_v15 }
 0x292   :  { %v3277_v20 = vpop.eup %3276 }
 0x293   :  { %v238_v21 = vmul.f32 %v3277_v20, %v222_v58 }
 0x295   :  { %v244_v23 = vmul.f32 %v243_v19, %v238_v21 }
 0x296   :  { %v3279_v24 = vpop.eup %3278 }
 0x297   :  { %v239_v25 = vmul.f32 %v3279_v24, %v223_v62  ;;  %v3538_v26 = vadd.f32 %v249_v22, %v244_v23 }
 0x299   :  { %v245_v27 = vmul.f32 %v243_v19, %v239_v25  ;;  %2950 = vmatprep.mubr.msk.f32.mxu1 %vm212_vm8, %v3538_v26 }
 0x29b   :  { %v3542_v28 = vadd.f32 %v249_v22, %v245_v27 }
 0x29d   :  { %2951 = vmatmul.mubr.msk.f32.vlgmr.msra.gmra.mrb[0].mxu1 %vm212_vm8, %v3542_v28 }
 0x29e   :  { %2955 = vmatprep.mubr.msk.f32.mxu1 %vm3343_vm6, %v3341_v36 }
 0x370   :  { %v2952_v30 = vpop.f32.mrb[0].mxu1 }
 0x371   :  { %v3551_v31 = vadd.f32 %v2952_v30, %v2774_v29  ;;  %v367_v32 = vpop.f32.mrb[1].mxu1 }
 0x372   :  { %v368_v33 = vadd.f32 %v2774_v29, %v367_v32 }
 0x373   :  { %380 = vrot.lane.b32.xlu0 %v3551_v31, %s3344_s19  ;;  %v385_v40 = vmul.f32 0.25, %v3551_v31 }
 0x374   :  { %378 = vrot.lane.b32.xlu1 %v368_v33, %s3344_s19  ;;  %v384_v38 = vmul.f32 0.25, %v368_v33 }
 0x378   :  { %408 = vrot.lane.b32.xlu1 %v368_v33, %s3345_s20 }
 0x37c   :  { %486 = vrot.lane.b32.xlu1 %v3551_v31, %s3345_s20 }
 0x3e5   :  { %v3559_v34 = vpop.permute.xlu0 %380 }
 0x3e6   :  { %640 = vrot.lane.b32.xlu1 %v3559_v34, %s3345_s20  ;;  %v3563_v35 = vpop.permute.xlu1 %378  ;;  %v387_v44 = vmul.f32 0.25, %v3559_v34 }
 0x3e7   :  { %563 = vrot.lane.b32.xlu0 %v3563_v35, %s3345_s20  ;;  %v386_v42 = vmul.f32 0.25, %v3563_v35 }
 0x3ea   :  { %v409_v37 = vpop.permute.xlu1 %408 }
 0x3eb   :  { %2954 = vmatpush3.xpose.msk.msra.mxu1 %vm410_vm7, %v409_v37 }
 0x3ec   :  { %2958 = vmatprep.subr.mxu1 %v3341_v36 }
 0x3ee   :  { %v487_v39 = vpop.permute.xlu1 %486  ;;  %2956 = vmatmul.mubr.msk.f32.vlgmr.msra.gmra.mrb[2].mxu1 %vm410_vm7, %v384_v38 }
 0x3ef   :  { %2959 = vmatpush3.xpose.msk.msra.mxu1 %vm410_vm7, %v487_v39  ;;  %2960 = vmatprep.mubr.msk.f32.mxu1 %vm3343_vm6, %v3341_v36 }
 0x3f0   :  { %2963 = vmatprep.subr.mxu1 %v3341_v36 }
 0x3f2   :  { %2961 = vmatmul.mubr.msk.f32.vlgmr.msra.gmra.mrb[4].mxu1 %vm410_vm7, %v385_v40 }
 0x3f3   :  { %2965 = vmatprep.mubr.msk.f32.mxu1 %vm3343_vm6, %v3341_v36 }
 0x458   :  { %v641_v43 = vpop.permute.xlu1 %640 }
 0x459   :  { %v564_v41 = vpop.permute.xlu0 %563 }
 0x45a   :  { %2964 = vmatpush3.xpose.msk.msra.mxu1 %vm410_vm7, %v564_v41 }
 0x45b   :  { %2968 = vmatprep.subr.mxu1 %v3341_v36 }
 0x45d   :  { %2966 = vmatmul.mubr.msk.f32.vlgmr.msra.gmra.mrb[6].mxu1 %vm410_vm7, %v386_v42 }
 0x45e   :  { %2969 = vmatpush3.xpose.msk.msra.mxu1 %vm410_vm7, %v641_v43  ;;  %2970 = vmatprep.mubr.msk.f32.mxu1 %vm3343_vm6, %v3341_v36 }
 0x45f   :  { %2973 = vmatprep.subr.mxu1 %v3341_v36 }
 0x461   :  { %2971 = vmatmul.mubr.msk.f32.vlgmr.msra.gmra.mrb[8].mxu1 %vm410_vm7, %v387_v44 }
 0x462   :  { %2975 = vmatprep.mubr.msk.f32.mxu1 %vm3343_vm6, %v3341_v36 }
 0x4c1   :  { %v482_v57 = vpop.f32.mrb[2].mxu1 }
 0x4c2   :  { %v483_v58 = vadd.f32 %v482_v57, %v3596_v55  ;;  %v2957_v59 = vpop.f32.mrb[3].mxu1 }
 0x4c3   :  { %v1077_v59 = vld [vmem:[%s3975_s5 + $0x8] sm:$0xff] }
 0x4c4   :  { %v718_v61 = vsel %vm717_vm10, %v483_v58, -inf }
 0x4c5   :  { %719 = vmax.xlane.f32.xlu0 %v718_v61  ;;  %v559_v62 = vpop.f32.mrb[4].mxu1 }
 0x4c6   :  { %v560_v63 = vadd.f32 %v559_v62, %v3600_v60  ;;  %v2962_v0 = vpop.f32.mrb[5].mxu1 }
 0x4c7   :  { %v1078_v0 = vld [vmem:[%s3975_s5 + $0x10] sm:$0xff] }
 0x4c8   :  { %v721_v1 = vsel %vm717_vm10, %v560_v63, -inf }
 0x4c9   :  { %722 = vmax.xlane.f32.xlu1 %v721_v1  ;;  %v1079_v1 = vld [vmem:[%s3975_s5 + $0x18] sm:$0xff] }
 0x4ca   :  { %v3184_v2 = vpack.c.bf16 %v1079_v1, %v1078_v0  ;;  %v1307_v1 = vld [vmem:[%s3978_s8] sm:$0xff] }
 0x4da   :  { %762 = vrot.lane.b32.xlu1 %v368_v33, %s3347_s1 }
 0x530   :  { %v636_v5 = vpop.f32.mrb[6].mxu1 }
 0x531   :  { %v637_v6 = vadd.f32 %v636_v5, %v3607_v3  ;;  %v2967_v7 = vpop.f32.mrb[7].mxu1 }
 0x533   :  { %v724_v10 = vsel %vm717_vm10, %v637_v6, -inf }
 0x534   :  { %725 = vmax.xlane.f32.xlu0 %v724_v10  ;;  %v713_v11 = vpop.f32.mrb[8].mxu1 }
 0x535   :  { %v714_v12 = vadd.f32 %v713_v11, %v3611_v8  ;;  %v2972_v13 = vpop.f32.mrb[9].mxu1 }
 0x537   :  { %v727_v15 = vsel %vm717_vm10, %v714_v12, -inf }
 0x538   :  { %728 = vmax.xlane.f32.xlu0 %v727_v15 }
 0x552   :  { %v720_v17 = vpop.xlane.xlu0 %719 }
 0x553   :  { %v730_v19 = vsub.f32 %v483_v58, %v720_v17  ;;  %v1076_v58 = vld [vmem:[%s3975_s5] sm:$0xff] }
 0x554   :  { %v3180_v61 = vpack.c.bf16 %v1077_v59, %v1076_v58 }
 0x555   :  { %v734_v20 = vmul.f32 1.442695, %v730_v19  ;;  %v3660_v19 = vld [vmem:[%s3976_s9] sm:$0x3f] }
 0x556   :  { %v723_v21 = vpop.xlane.xlu1 %722  ;;  %3181 = vmatprep.subr.bf16.mxu0 %v3180_v61 }
 0x557   :  { %3280 = vpow2.f32 %v734_v20  ;;  %v731_v22 = vsub.f32 %v560_v63, %v723_v21  ;;  %3183 = vmatpush3.bf16.msra.mxu0 %v3180_v61  ;;  %v1083_v20 = vrot.slane %v3660_v19, %v3528_v16 }
 0x558   :  { %3185 = vmatprep.subr.bf16.mxu0 %v3184_v2 }
 0x559   :  { %v736_v23 = vmul.f32 1.442695, %v731_v22 }
 0x55a   :  { %v763_v24 = vpop.permute.xlu1 %762 }
 0x55b   :  { %3282 = vpow2.f32 %v736_v23  ;;  %2974 = vmatpush3.msra.mxu1 %v763_v24  ;;  %3187 = vmatpush3.bf16.msra.mxu0 %v3184_v2  ;;  %v1308_v2 = vld [vmem:[%s3978_s8 + $0x8] sm:$0xff] }
 0x55c   :  { %2978 = vmatprep.subr.mxu1 %v3341_v36 }
 0x561   :  { %v3281_v25 = vpop.eup %3280 }
 0x562   :  { %v742_v27 = vsel %vm717_vm10, %v3281_v25, 0.0 }
 0x563   :  { %743 = vadd.xlane.f32.xlu1 %v742_v27 }
 0x565   :  { %v3283_v29 = vpop.eup %3282 }
 0x566   :  { %v745_v30 = vsel %vm717_vm10, %v3283_v29, 0.0 }
 0x567   :  { %746 = vadd.xlane.f32.xlu0 %v745_v30 }
 0x5c1   :  { %v726_v32 = vpop.xlane.xlu0 %725 }
 0x5c2   :  { %v732_v33 = vsub.f32 %v637_v6, %v726_v32 }
 0x5c4   :  { %v738_v37 = vmul.f32 1.442695, %v732_v33 }
 0x5c5   :  { %v729_v38 = vpop.xlane.xlu0 %728 }
 0x5c6   :  { %3284 = vpow2.f32 %v738_v37  ;;  %v733_v39 = vsub.f32 %v714_v12, %v729_v38 }
 0x5c8   :  { %v740_v40 = vmul.f32 1.442695, %v733_v39 }
 0x5ca   :  { %3286 = vpow2.f32 %v740_v40 }
 0x5d0   :  { %v3285_v41 = vpop.eup %3284 }
 0x5d1   :  { %v748_v42 = vsel %vm717_vm10, %v3285_v41, 0.0 }
 0x5d2   :  { %749 = vadd.xlane.f32.xlu1 %v748_v42 }
 0x5d4   :  { %v3287_v43 = vpop.eup %3286 }
 0x5d5   :  { %v751_v44 = vsel %vm717_vm10, %v3287_v43, 0.0 }
 0x5d6   :  { %752 = vadd.xlane.f32.xlu0 %v751_v44  ;;  %v1206_v44 = vld [vmem:[%s3977_s6 + $0x8] sm:$0xff] }
 0x5e3   :  { %914 = vrot.lane.b32.xlu1 %v3563_v35, %s3347_s1 }
 0x5e7   :  { %990 = vrot.lane.b32.xlu1 %v3559_v34, %s3347_s1 }
 0x5ec   :  { %838 = vrot.lane.b32.xlu0 %v3551_v31, %s3347_s1 }
 0x5f0   :  { %v744_v45 = vpop.xlane.xlu1 %743 }
 0x5f1   :  { %3288 = vrcp.f32 %v744_v45 }
 0x5f4   :  { %v747_v48 = vpop.xlane.xlu0 %746 }
 0x5f5   :  { %3290 = vrcp.f32 %v747_v48 }
 0x5fb   :  { %v3289_v46 = vpop.eup %3288 }
 0x5fc   :  { %v758_v47 = vmul.f32 %v3289_v46, %v3281_v25  ;;  %v1207_v46 = vld [vmem:[%s3977_s6 + $0x10] sm:$0xff] }
 0x5fe   :  { %2976 = vmatmul.mubr.msk.f32.vlgmr.msra.gmra.mrb[10].mxu1 %vm717_vm10, %v758_v47  ;;  %v1208_v47 = vld [vmem:[%s3977_s6 + $0x18] sm:$0xff] }
 0x5ff   :  { %2980 = vmatprep.mubr.msk.f32.mxu1 %vm3343_vm6, %v3341_v36  ;;  %v3291_v50 = vpop.eup %3290  ;;  %v3192_v48 = vpack.c.bf16 %v1208_v47, %v1207_v46 }
 0x600   :  { %v759_v34 = vmul.f32 %v3291_v50, %v3283_v29 }
 0x65f   :  { %v750_v49 = vpop.xlane.xlu1 %749 }
 0x660   :  { %3292 = vrcp.f32 %v750_v49 }
 0x663   :  { %v753_v35 = vpop.xlane.xlu0 %752  ;;  %v915_v51 = vpop.permute.xlu1 %914 }
 0x664   :  { %3294 = vrcp.f32 %v753_v35 }
 0x667   :  { %v839_v52 = vpop.permute.xlu0 %838  ;;  %v991_v54 = vpop.permute.xlu1 %990 }
 0x668   :  { %2979 = vmatpush3.msra.mxu1 %v839_v52 }
 0x669   :  { %2981 = vmatmul.mubr.msk.f32.vlgmr.msra.gmra.mrb[12].mxu1 %vm717_vm10, %v759_v34  ;;  %2983 = vmatprep.subr.mxu1 %v3341_v36 }
 0x66a   :  { %v3293_v31 = vpop.eup %3292  ;;  %2984 = vmatpush3.msra.mxu1 %v915_v51  ;;  %2985 = vmatprep.mubr.msk.f32.mxu1 %vm3343_vm6, %v3341_v36 }
 0x66b   :  { %v760_v53 = vmul.f32 %v3293_v31, %v3285_v41  ;;  %2988 = vmatprep.subr.mxu1 %v3341_v36  ;;  %v3683_v31 = vsub.s32 2, %v3525_v14 }
 0x66d   :  { %2986 = vmatmul.mubr.msk.f32.vlgmr.msra.gmra.mrb[14].mxu1 %vm717_vm10, %v760_v53  ;;  %v1196_v53 = vrot.slane %v3660_v19, %v3534_v18 }
 0x66e   :  { %v3295_v56 = vpop.eup %3294  ;;  %2989 = vmatpush3.msra.mxu1 %v991_v54  ;;  %2990 = vmatprep.mubr.msk.f32.mxu1 %vm3343_vm6, %v3341_v36 }
 0x66f   :  { %v761_v57 = vmul.f32 %v3295_v56, %v3287_v43 }
 0x671   :  { %2991 = vmatmul.mubr.msk.f32.vlgmr.msra.gmra.mrb[16].mxu1 %vm717_vm10, %v761_v57  ;;  %v1202_v57 = vrot.slane %v3660_v19, %v3683_v31 }
 0x6d1   :  { %v834_v62 = vpop.f32.mrb[10].mxu1 }
 0x6d2   :  { %v2977_v63 = vpop.f32.mrb[11].mxu1 }
 0x73c   :  { %v910_v4 = vpop.f32.mrb[12].mxu1 }
 0x73d   :  { %v2982_v5 = vpop.f32.mrb[13].mxu1 }
 0x73e   :  { %v1309_v5 = vld [vmem:[%s3978_s8 + $0x10] sm:$0xff] }
 0x740   :  { %v986_v6 = vpop.f32.mrb[14].mxu1 }
 0x741   :  { %1068 = vrot.lane.b32.xlu0 %v986_v6, %s3348_s30  ;;  %v2987_v7 = vpop.f32.mrb[15].mxu1  ;;  %v1310_v6 = vld [vmem:[%s3978_s8 + $0x18] sm:$0xff] }
 0x742   :  { %v3200_v7 = vpack.c.bf16 %v1310_v6, %v1309_v5 }
 0x744   :  { %v1062_v10 = vpop.f32.mrb[16].mxu1 }
 0x745   :  { %1070 = vrot.lane.b32.xlu1 %v1062_v10, %s3348_s30  ;;  %v2992_v11 = vpop.f32.mrb[17].mxu1  ;;  %v1311_v10 = vld [vmem:[%s3978_s8 + $0x20] sm:$0xff] }
 0x746   :  { %v1312_v11 = vld [vmem:[%s3978_s8 + $0x28] sm:$0xff] }
 0x7b3   :  { %v1069_v12 = vpop.permute.xlu0 %1068 }
 0x7b4   :  { %v1074_v13 = vsel %vm410_vm7, %v834_v62, %v1069_v12  ;;  %v3204_v12 = vpack.c.bf16 %v1312_v11, %v1311_v10  ;;  %v1431_v10 = vsub.s32 4, %v3525_v14  ;;  %v1437_v11 = vsub.s32 5, %v3525_v14 }
 0x7b5   :  { %3001 = vmatprep.mubr.msk.f32.mxu0 %vm212_vm8, %v1074_v13  ;;  %v1313_v13 = vld [vmem:[%s3978_s8 + $0x30] sm:$0xff] }
 0x7b7   :  { %v1071_v15 = vpop.permute.xlu1 %1070 }
 0x7b8   :  { %v1075_v17 = vsel %vm410_vm7, %v910_v4, %v1071_v15  ;;  %v3196_v4 = vpack.c.bf16 %v1308_v2, %v1307_v1  ;;  %v1314_v15 = vld [vmem:[%s3978_s8 + $0x38] sm:$0xff] }
 0x7b9   :  { %3002 = vmatmul.mubr.msk.f32.vlgmr.msra.gmra.mrb[4].mxu0 %vm212_vm8, %v1075_v17  ;;  %v3208_v17 = vpack.c.bf16 %v1314_v15, %v1313_v13 }
 0x7ba   :  { %3197 = vmatprep.subr.bf16.mxu0 %v3196_v4 }
 0x7bb   :  { %3199 = vmatpush3.bf16.msra.mxu0 %v3196_v4 }
 0x7bc   :  { %3201 = vmatprep.subr.bf16.mxu0 %v3200_v7 }
 0x7bf   :  { %3203 = vmatpush3.bf16.msra.mxu0 %v3200_v7 }
 0x7c0   :  { %3205 = vmatprep.subr.bf16.mxu0 %v3204_v12 }
 0x7c3   :  { %3207 = vmatpush3.bf16.msra.mxu0 %v3204_v12  ;;  %v1432_v12 = vrot.slane %v3660_v19, %v1431_v10 }
 0x7c4   :  { %3209 = vmatprep.subr.bf16.mxu0 %v3208_v17 }
 0x7c7   :  { %3211 = vmatpush3.bf16.msra.mxu0 %v3208_v17 }
 0x7c8   :  { %3050 = vmatprep.subr.mxu0 %v3341_v36 }
 0x88c   :  { %v3003_v21 = vpop.f32.mrb[4].mxu0 }
 0x88d   :  { %v1162_v22 = vadd.f32 %v3003_v21, %v1083_v20  ;;  %v1156_v23 = vpop.f32.mrb[5].mxu0 }
 0x88e   :  { %v1157_v24 = vadd.f32 %v1156_v23, %v1083_v20  ;;  %v2791_v20 = vld [vmem:[%s3979_s7] ss:$0 sm:$0xff] }
 0x88f   :  { %v1166_v25 = vadd.f32 %v1162_v22, %v3542_v28 }
 0x890   :  { %v1165_v27 = vadd.f32 %v1157_v24, %v3538_v26  ;;  %v1205_v26 = vld [vmem:[%s3977_s6] sm:$0xff] }
 0x891   :  { %v1170_v29 = vsel %vm212_vm8, %v1166_v25, 0.0  ;;  %v3188_v45 = vpack.c.bf16 %v1206_v44, %v1205_v26 }
 0x892   :  { %1171 = vadd.xlane.f32.xlu1 %v1170_v29  ;;  %v1167_v30 = vsel %vm212_vm8, %v1165_v27, 0.0 }
 0x893   :  { %1168 = vadd.xlane.f32.xlu0 %v1167_v30  ;;  %3189 = vmatprep.subr.bf16.mxu1 %v3188_v45 }
 0x894   :  { %3191 = vmatpush3.bf16.msra.mxu1 %v3188_v45 }
 0x895   :  { %3193 = vmatprep.subr.bf16.mxu1 %v3192_v48 }
 0x898   :  { %3195 = vmatpush3.bf16.msra.mxu1 %v3192_v48 }
 0x91f   :  { %v1172_v32 = vpop.xlane.xlu1 %1171 }
 0x920   :  { %v1174_v33 = vmul.f32 0.03125, %v1172_v32  ;;  %v1169_v37 = vpop.xlane.xlu0 %1168 }
 0x921   :  { %v1173_v38 = vmul.f32 0.03125, %v1169_v37 }
 0x922   :  { %v1176_v39 = vsub.f32 %v1166_v25, %v1174_v33 }
 0x923   :  { %v1175_v40 = vsub.f32 %v1165_v27, %v1173_v38 }
 0x924   :  { %v1178_v43 = vmul.f32 %v1176_v39, %v1176_v39 }
 0x925   :  { %v1177_v41 = vmul.f32 %v1175_v40, %v1175_v40 }
 0x926   :  { %v1182_v28 = vsel %vm212_vm8, %v1178_v43, 0.0 }
 0x927   :  { %v1179_v42 = vsel %vm212_vm8, %v1177_v41, 0.0  ;;  %v1317_v41 = vsub.s32 3, %v3525_v14  ;;  %v2672_v14 = vld [vmem:[%s3981_s11] sm:$0xff] }
 0x928   :  { %1180 = vadd.xlane.f32.xlu0 %v1179_v42 }
 0x929   :  { %v1318_v42 = vrot.slane %v3660_v19, %v1317_v41 }
 0x92c   :  { %1183 = vadd.xlane.f32.xlu0 %v1182_v28 }
 0x9b5   :  { %v1181_v49 = vpop.xlane.xlu0 %1180 }
 0x9b6   :  { %v1185_v35 = vmul.f32 0.03125, %v1181_v49 }
 0x9b8   :  { %v1187_v50 = vadd.f32 1e-12, %v1185_v35 }
 0x9b9   :  { %v1184_v34 = vpop.xlane.xlu0 %1183 }
 0x9ba   :  { %3296 = vrsqrt.f32 %v1187_v50  ;;  %v1186_v51 = vmul.f32 0.03125, %v1184_v34 }
 0x9bc   :  { %v1188_v52 = vadd.f32 1e-12, %v1186_v51 }
 0x9be   :  { %3298 = vrsqrt.f32 %v1188_v52 }
 0x9c4   :  { %v3297_v54 = vpop.eup %3296 }
 0x9c5   :  { %v1191_v56 = vmul.f32 %v3297_v54, %v1175_v40 }
 0x9c7   :  { %v1197_v58 = vmul.f32 %v1196_v53, %v1191_v56 }
 0x9c8   :  { %v3299_v59 = vpop.eup %3298 }
 0x9c9   :  { %v1192_v61 = vmul.f32 %v3299_v59, %v1176_v39  ;;  %v1203_v62 = vadd.f32 %v1202_v57, %v1197_v58  ;;  %v2797_v58 = vld [vmem:[%s3971_s3 + $0x20] sm:$0xff]  ;;  %v2798_v59 = vld [vmem:[%s3971_s3 + $0x28] sm:$0xff] }
 0x9cb   :  { %v1198_v63 = vmul.f32 %v1196_v53, %v1192_v61  ;;  %3012 = vmatprep.mubr.msk.f32.mxu1 %vm212_vm8, %v1203_v62  ;;  %v3212_v61 = vpack.c.bf16 %v2798_v59, %v2797_v58 }
 0x9cd   :  { %v1204_v0 = vadd.f32 %v1202_v57, %v1198_v63  ;;  %v2800_v63 = vld [vmem:[%s3971_s3 + $0x38] sm:$0xff]  ;;  %3213 = vmatprep.subr.bf16.mxu1 %v3212_v61 }
 0x9cf   :  { %3013 = vmatmul.mubr.msk.f32.vlgmr.msra.gmra.mrb[18].mxu1 %vm212_vm8, %v1204_v0 }
 0x9d0   :  { %3215 = vmatpush3.bf16.msra.mxu1 %v3212_v61 }
 0xaa2   :  { %v3014_v21 = vpop.f32.mrb[18].mxu1 }
 0xaa3   :  { %v1294_v22 = vadd.f32 %v3014_v21, %v2791_v20  ;;  %v1288_v23 = vpop.f32.mrb[19].mxu1  ;;  %v1438_v21 = vrot.slane %v3660_v19, %v1437_v11 }
 0xaa4   :  { %v1289_v24 = vadd.f32 %v2791_v20, %v1288_v23 }
 0xaa5   :  { %v1300_v25 = vmul.f32 0.70710677, %v1294_v22  ;;  %v1298_v38 = vmul.f32 0.5, %v1294_v22 }
 0xaa6   :  { %v1299_v27 = vmul.f32 0.70710677, %v1289_v24  ;;  %v1297_v33 = vmul.f32 0.5, %v1289_v24 }
 0xaa7   :  { %3300 = verf.f32 %v1300_v25 }
 0xaa8   :  { %3302 = verf.f32 %v1299_v27  ;;  %v2802_v27 = vld [vmem:[%s3973_s4 + $0x1] ss:$0 sm:$0xff] }
 0xab1   :  { %v3301_v29 = vpop.eup %3300 }
 0xab2   :  { %v3303_v30 = vpop.eup %3302  ;;  %v1304_v32 = vadd.f32 1.0, %v3301_v29 }
 0xab3   :  { %v1303_v37 = vadd.f32 1.0, %v3303_v30 }
 0xab4   :  { %v1306_v40 = vmul.f32 %v1304_v32, %v1298_v38 }
 0xab5   :  { %v1305_v39 = vmul.f32 %v1303_v37, %v1297_v33 }
 0xab7   :  { %3031 = vmatprep.mubr.msk.f32.mxu0 %vm1319_vm11, %v1305_v39 }
 0xab8   :  { %3032 = vmatmul.mubr.msk.f32.vlgmr.msra.gmra.mrb[6].mxu0 %vm1319_vm11, %v1306_v40 }
 0xab9   :  { %3052 = vmatprep.mubr.msk.f32.mxu0 %vm3343_vm6, %v3341_v36 }
 0xb8b   :  { %v3033_v43 = vpop.f32.mrb[6].mxu0 }
 0xb8c   :  { %v1398_v28 = vadd.f32 %v3033_v43, %v1318_v42  ;;  %v1392_v26 = vpop.f32.mrb[7].mxu0 }
 0xb8d   :  { %v1393_v44 = vadd.f32 %v1392_v26, %v1318_v42 }
 0xb8e   :  { %v1402_v45 = vadd.f32 %v1398_v28, %v1204_v0 }
 0xb8f   :  { %v1401_v46 = vadd.f32 %v1393_v44, %v1203_v62  ;;  %v2799_v62 = vld [vmem:[%s3971_s3 + $0x30] sm:$0xff] }
 0xb90   :  { %v1406_v47 = vsel %vm212_vm8, %v1402_v45, 0.0  ;;  %v3216_v0 = vpack.c.bf16 %v2800_v63, %v2799_v62 }
 0xb91   :  { %1407 = vadd.xlane.f32.xlu0 %v1406_v47  ;;  %v1403_v48 = vsel %vm212_vm8, %v1401_v46, 0.0 }
 0xb92   :  { %1404 = vadd.xlane.f32.xlu1 %v1403_v48  ;;  %3217 = vmatprep.subr.bf16.mxu1 %v3216_v0 }
 0xb93   :  { %3219 = vmatpush3.bf16.msra.mxu1 %v3216_v0 }
 0xb94   :  { %3045 = vmatprep.subr.mxu1 %v3341_v36 }
 0xc1e   :  { %v1408_v49 = vpop.xlane.xlu0 %1407 }
 0xc1f   :  { %v1410_v35 = vmul.f32 0.03125, %v1408_v49  ;;  %v1405_v50 = vpop.xlane.xlu1 %1404 }
 0xc20   :  { %v1409_v34 = vmul.f32 0.03125, %v1405_v50 }
 0xc21   :  { %v1412_v51 = vsub.f32 %v1402_v45, %v1410_v35 }
 0xc22   :  { %v1411_v52 = vsub.f32 %v1401_v46, %v1409_v34 }
 0xc23   :  { %v1414_v53 = vmul.f32 %v1412_v51, %v1412_v51 }
 0xc24   :  { %v1413_v54 = vmul.f32 %v1411_v52, %v1411_v52 }
 0xc25   :  { %v1418_v56 = vsel %vm212_vm8, %v1414_v53, 0.0 }
 0xc26   :  { %1419 = vadd.xlane.f32.xlu0 %v1418_v56  ;;  %v1415_v57 = vsel %vm212_vm8, %v1413_v54, 0.0 }
 0xc27   :  { %1416 = vadd.xlane.f32.xlu1 %v1415_v57 }
 0xcb3   :  { %v1420_v1 = vpop.xlane.xlu0 %1419 }
 0xcb4   :  { %v1422_v2 = vmul.f32 0.03125, %v1420_v1  ;;  %v1417_v4 = vpop.xlane.xlu1 %1416 }
 0xcb5   :  { %v1421_v5 = vmul.f32 0.03125, %v1417_v4 }
 0xcb6   :  { %v1424_v6 = vadd.f32 1e-12, %v1422_v2 }
 0xcb7   :  { %v1423_v7 = vadd.f32 1e-12, %v1421_v5 }
 0xcb8   :  { %3304 = vrsqrt.f32 %v1424_v6 }
 0xcb9   :  { %3306 = vrsqrt.f32 %v1423_v7 }
 0xcc2   :  { %v3305_v13 = vpop.eup %3304 }
 0xcc3   :  { %v3307_v15 = vpop.eup %3306  ;;  %v1428_v17 = vmul.f32 %v3305_v13, %v1412_v51 }
 0xcc4   :  { %v1427_v20 = vmul.f32 %v3307_v15, %v1411_v52 }
 0xcc5   :  { %v1434_v22 = vmul.f32 %v1432_v12, %v1428_v17 }
 0xcc6   :  { %v1433_v23 = vmul.f32 %v1432_v12, %v1427_v20 }
 0xcc7   :  { %v3754_v25 = vadd.f32 %v1438_v21, %v1434_v22 }
 0xcc8   :  { %v3752_v24 = vadd.f32 %v1438_v21, %v1433_v23 }
 0xcca   :  { %3042 = vmatprep.mubr.msk.f32.mxu1 %vm212_vm8, %v3752_v24 }
 0xccb   :  { %3043 = vmatmul.mubr.msk.f32.vlgmr.msra.gmra.mrb[20].mxu1 %vm212_vm8, %v3754_v25 }
 0xccc   :  { %3047 = vmatprep.mubr.msk.f32.mxu1 %vm3343_vm6, %v3341_v36 }
 0xd9e   :  { %v3044_v19 = vpop.f32.mrb[20].mxu1 }
 0xd9f   :  { %v3765_v29 = vadd.f32 %v3044_v19, %v2802_v27  ;;  %v1528_v30 = vpop.f32.mrb[21].mxu1 }
 0xda0   :  { %v1529_v32 = vadd.f32 %v2802_v27, %v1528_v30 }
 0xda1   :  { %1541 = vrot.lane.b32.xlu0 %v3765_v29, %s3344_s19  ;;  %v1546_v42 = vmul.f32 0.25, %v3765_v29 }
 0xda2   :  { %1539 = vrot.lane.b32.xlu1 %v1529_v32, %s3344_s19  ;;  %v1545_v39 = vmul.f32 0.25, %v1529_v32 }
 0xda6   :  { %1549 = vrot.lane.b32.xlu1 %v1529_v32, %s3345_s20 }
 0xdaa   :  { %1626 = vrot.lane.b32.xlu1 %v3765_v29, %s3345_s20 }
 0xe13   :  { %v3773_v33 = vpop.permute.xlu0 %1541 }
 0xe14   :  { %1780 = vrot.lane.b32.xlu1 %v3773_v33, %s3345_s20  ;;  %v3777_v37 = vpop.permute.xlu1 %1539  ;;  %v1548_v26 = vmul.f32 0.25, %v3773_v33 }
 0xe15   :  { %1703 = vrot.lane.b32.xlu0 %v3777_v37, %s3345_s20  ;;  %v1547_v44 = vmul.f32 0.25, %v3777_v37 }
 0xe18   :  { %v1550_v38 = vpop.permute.xlu1 %1549 }
 0xe19   :  { %3046 = vmatpush3.xpose.msk.msra.mxu1 %vm410_vm7, %v1550_v38 }
 0xe1a   :  { %3055 = vmatprep.subr.mxu1 %v3341_v36 }
 0xe1c   :  { %v1627_v40 = vpop.permute.xlu1 %1626  ;;  %3048 = vmatmul.mubr.msk.f32.vlgmr.msra.gmra.mrb[22].mxu1 %vm410_vm7, %v1545_v39 }
 0xe1d   :  { %3051 = vmatpush3.xpose.msk.msra.mxu0 %vm410_vm7, %v1627_v40  ;;  %3057 = vmatprep.mubr.msk.f32.mxu1 %vm3343_vm6, %v3341_v36 }
 0xe1e   :  { %3060 = vmatprep.subr.mxu0 %v3341_v36 }
 0xe20   :  { %3053 = vmatmul.mubr.msk.f32.vlgmr.msra.gmra.mrb[8].mxu0 %vm410_vm7, %v1546_v42 }
 0xe21   :  { %3062 = vmatprep.mubr.msk.f32.mxu0 %vm3343_vm6, %v3341_v36 }
 0xe86   :  { %v1781_v43 = vpop.permute.xlu1 %1780 }
 0xe87   :  { %v1704_v28 = vpop.permute.xlu0 %1703  ;;  %3061 = vmatpush3.xpose.msk.msra.mxu0 %vm410_vm7, %v1781_v43 }
 0xe88   :  { %3056 = vmatpush3.xpose.msk.msra.mxu1 %vm410_vm7, %v1704_v28  ;;  %3070 = vmatprep.subr.mxu0 %v3341_v36 }
 0xe89   :  { %3065 = vmatprep.subr.mxu1 %v3341_v36 }
 0xe8a   :  { %3063 = vmatmul.mubr.msk.f32.vlgmr.msra.gmra.mrb[10].mxu0 %vm410_vm7, %v1548_v26 }
 0xe8b   :  { %3058 = vmatmul.mubr.msk.f32.vlgmr.msra.gmra.mrb[24].mxu1 %vm410_vm7, %v1547_v44  ;;  %3072 = vmatprep.mubr.msk.f32.mxu0 %vm3343_vm6, %v3341_v36  ;;  %v2817_v44 = vld [vmem:[%s3975_s5 + $0x20] sm:$0xff] }
 0xe8c   :  { %3067 = vmatprep.mubr.msk.f32.mxu1 %vm3343_vm6, %v3341_v36 }
 0xeef   :  { %v1622_v45 = vpop.f32.mrb[22].mxu1 }
 0xef0   :  { %v1623_v46 = vadd.f32 %v1622_v45, %v3596_v55  ;;  %v3049_v47 = vpop.f32.mrb[23].mxu1  ;;  %v2818_v45 = vld [vmem:[%s3975_s5 + $0x28] sm:$0xff] }
 0xef2   :  { %v1857_v48 = vsel %vm717_vm10, %v1623_v46, -inf }
 0xef3   :  { %v1699_v49 = vpop.f32.mrb[8].mxu0  ;;  %1858 = vmax.xlane.f32.xlu0 %v1857_v48 }
 0xef4   :  { %v1700_v35 = vadd.f32 %v1699_v49, %v3600_v60  ;;  %v3054_v50 = vpop.f32.mrb[9].mxu0  ;;  %v2819_v49 = vld [vmem:[%s3975_s5 + $0x30] sm:$0xff] }
 0xef6   :  { %v1860_v34 = vsel %vm717_vm10, %v1700_v35, -inf }
 0xef7   :  { %1861 = vmax.xlane.f32.xlu1 %v1860_v34 }
 0xf08   :  { %1901 = vrot.lane.b32.xlu1 %v1529_v32, %s3347_s1 }
 0xf5d   :  { %v1853_v51 = vpop.f32.mrb[10].mxu0 }
 0xf5e   :  { %v1776_v52 = vpop.f32.mrb[24].mxu1  ;;  %v3064_v53 = vpop.f32.mrb[11].mxu0  ;;  %v1854_v55 = vadd.f32 %v1853_v51, %v3611_v8 }
 0xf5f   :  { %v1777_v54 = vadd.f32 %v1776_v52, %v3607_v3  ;;  %v3059_v56 = vpop.f32.mrb[25].mxu1 }
 0xf60   :  { %v1866_v58 = vsel %vm717_vm10, %v1854_v55, -inf }
 0xf61   :  { %v1863_v57 = vsel %vm717_vm10, %v1777_v54, -inf }
 0xf62   :  { %1864 = vmax.xlane.f32.xlu0 %v1863_v57 }
 0xf66   :  { %1867 = vmax.xlane.f32.xlu0 %v1866_v58 }
 0xf80   :  { %v1859_v60 = vpop.xlane.xlu0 %1858 }
 0xf81   :  { %v1869_v59 = vsub.f32 %v1623_v46, %v1859_v60  ;;  %v3220_v46 = vpack.c.bf16 %v2818_v45, %v2817_v44 }
 0xf83   :  { %v1873_v61 = vmul.f32 1.442695, %v1869_v59  ;;  %v3854_v59 = vld [vmem:[%s3976_s9 + $0x8] sm:$0x3f] }
 0xf84   :  { %v1862_v62 = vpop.xlane.xlu1 %1861 }
 0xf85   :  { %3308 = vpow2.f32 %v1873_v61  ;;  %v1870_v63 = vsub.f32 %v1700_v35, %v1862_v62  ;;  %v2820_v35 = vld [vmem:[%s3975_s5 + $0x38] sm:$0xff]  ;;  %v2223_v61 = vrot.slane %v3854_v59, %v3528_v16 }
 0xf86   :  { %v3224_v50 = vpack.c.bf16 %v2820_v35, %v2819_v49  ;;  %v2833_v35 = vld [vmem:[%s3978_s8 + $0x50] sm:$0xff] }
 0xf87   :  { %v1875_v0 = vmul.f32 1.442695, %v1870_v63 }
 0xf88   :  { %v1902_v1 = vpop.permute.xlu1 %1901 }
 0xf89   :  { %3310 = vpow2.f32 %v1875_v0  ;;  %3066 = vmatpush3.msra.mxu1 %v1902_v1 }
 0xf8a   :  { %3075 = vmatprep.subr.mxu1 %v3341_v36 }
 0xf8f   :  { %v3309_v3 = vpop.eup %3308 }
 0xf90   :  { %v1881_v8 = vsel %vm717_vm10, %v3309_v3, 0.0 }
 0xf91   :  { %1882 = vadd.xlane.f32.xlu1 %v1881_v8 }
 0xf93   :  { %v3311_v2 = vpop.eup %3310 }
 0xf94   :  { %v1884_v4 = vsel %vm717_vm10, %v3311_v2, 0.0 }
 0xf95   :  { %1885 = vadd.xlane.f32.xlu0 %v1884_v4 }
 0xfa2   :  { %2053 = vrot.lane.b32.xlu1 %v3777_v37, %s3347_s1 }
 0xfef   :  { %v1865_v5 = vpop.xlane.xlu0 %1864 }
 0xff0   :  { %v1871_v6 = vsub.f32 %v1777_v54, %v1865_v5 }
 0xff2   :  { %v1877_v7 = vmul.f32 1.442695, %v1871_v6 }
 0xff3   :  { %v1868_v12 = vpop.xlane.xlu0 %1867 }
 0xff4   :  { %3312 = vpow2.f32 %v1877_v7  ;;  %v1872_v13 = vsub.f32 %v1854_v55, %v1868_v12 }
 0xff6   :  { %v1879_v15 = vmul.f32 1.442695, %v1872_v13 }
 0xff8   :  { %3314 = vpow2.f32 %v1879_v15 }
 0xffe   :  { %v3313_v17 = vpop.eup %3312 }
 0xfff   :  { %v1887_v20 = vsel %vm717_vm10, %v3313_v17, 0.0 }
0x1000   :  { %1888 = vadd.xlane.f32.xlu1 %v1887_v20 }
0x1002   :  { %v3315_v21 = vpop.eup %3314 }
0x1003   :  { %v1890_v22 = vsel %vm717_vm10, %v3315_v21, 0.0 }
0x1004   :  { %1891 = vadd.xlane.f32.xlu0 %v1890_v22 }
0x1011   :  { %2129 = vrot.lane.b32.xlu1 %v3773_v33, %s3347_s1 }
0x101a   :  { %1977 = vrot.lane.b32.xlu0 %v3765_v29, %s3347_s1 }
0x101e   :  { %v1883_v23 = vpop.xlane.xlu1 %1882 }
0x101f   :  { %3316 = vrcp.f32 %v1883_v23  ;;  %v2825_v23 = vld [vmem:[%s3977_s6 + $0x30] sm:$0xff] }
0x1022   :  { %v2054_v30 = vpop.permute.xlu1 %2053  ;;  %v1886_v32 = vpop.xlane.xlu0 %1885 }
0x1023   :  { %3318 = vrcp.f32 %v1886_v32 }
0x1029   :  { %v3317_v27 = vpop.eup %3316 }
0x102a   :  { %v1897_v19 = vmul.f32 %v3317_v27, %v3309_v3  ;;  %v2826_v27 = vld [vmem:[%s3977_s6 + $0x38] sm:$0xff] }
0x102c   :  { %3068 = vmatmul.mubr.msk.f32.vlgmr.msra.gmra.mrb[26].mxu1 %vm717_vm10, %v1897_v19  ;;  %v3232_v19 = vpack.c.bf16 %v2826_v27, %v2825_v23 }
0x102d   :  { %3076 = vmatpush3.msra.mxu1 %v2054_v30  ;;  %3077 = vmatprep.mubr.msk.f32.mxu1 %vm3343_vm6, %v3341_v36  ;;  %v3319_v33 = vpop.eup %3318 }
0x102e   :  { %v1898_v39 = vmul.f32 %v3319_v33, %v3311_v2  ;;  %3221 = vmatprep.subr.bf16.mxu1 %v3220_v46 }
0x108d   :  { %v1889_v37 = vpop.xlane.xlu1 %1888 }
0x108e   :  { %3320 = vrcp.f32 %v1889_v37 }
0x1091   :  { %v1892_v38 = vpop.xlane.xlu0 %1891  ;;  %v2130_v40 = vpop.permute.xlu1 %2129 }
0x1092   :  { %3322 = vrcp.f32 %v1892_v38 }
0x1095   :  { %v1978_v29 = vpop.permute.xlu0 %1977 }
0x1096   :  { %3071 = vmatpush3.msra.mxu0 %v1978_v29  ;;  %v2336_v29 = vrot.slane %v3854_v59, %v3534_v18  ;;  %v2831_v18 = vld [vmem:[%s3978_s8 + $0x40] sm:$0xff] }
0x1097   :  { %3073 = vmatmul.mubr.msk.f32.vlgmr.msra.gmra.mrb[12].mxu0 %vm717_vm10, %v1898_v39  ;;  %3080 = vmatprep.subr.mxu0 %v3341_v36 }
0x1098   :  { %v3321_v42 = vpop.eup %3320  ;;  %3081 = vmatpush3.msra.mxu0 %v2130_v40  ;;  %3082 = vmatprep.mubr.msk.f32.mxu0 %vm3343_vm6, %v3341_v36 }
0x1099   :  { %v1899_v43 = vmul.f32 %v3321_v42, %v3313_v17 }
0x109b   :  { %3078 = vmatmul.mubr.msk.f32.vlgmr.msra.gmra.mrb[28].mxu1 %vm717_vm10, %v1899_v43  ;;  %v2342_v43 = vrot.slane %v3854_v59, %v3683_v31 }
0x109c   :  { %v3323_v28 = vpop.eup %3322  ;;  %3223 = vmatpush3.bf16.msra.mxu1 %v3220_v46 }
0x109d   :  { %v1900_v26 = vmul.f32 %v3323_v28, %v3315_v21  ;;  %3225 = vmatprep.subr.bf16.mxu1 %v3224_v50  ;;  %v2824_v21 = vld [vmem:[%s3977_s6 + $0x28] sm:$0xff] }
0x109f   :  { %3083 = vmatmul.mubr.msk.f32.vlgmr.msra.gmra.mrb[14].mxu0 %vm717_vm10, %v1900_v26 }
0x10a0   :  { %3227 = vmatpush3.bf16.msra.mxu1 %v3224_v50  ;;  %v2834_v50 = vld [vmem:[%s3978_s8 + $0x58] sm:$0xff] }
0x10ff   :  { %v1973_v47 = vpop.f32.mrb[26].mxu1 }
0x1100   :  { %v3069_v48 = vpop.f32.mrb[27].mxu1 }
0x1101   :  { %v2832_v48 = vld [vmem:[%s3978_s8 + $0x48] sm:$0xff] }
0x1102   :  { %v3236_v49 = vpack.c.bf16 %v2832_v48, %v2831_v18  ;;  %v2574_v48 = vrot.slane %v3854_v59, %v1431_v10  ;;  %v2673_v10 = vld [vmem:[%s3981_s11 + $0x8] sm:$0xff] }
0x1104   :  { %3237 = vmatprep.subr.bf16.mxu1 %v3236_v49 }
0x116a   :  { %v2049_v34 = vpop.f32.mrb[12].mxu0 }
0x116b   :  { %v3074_v51 = vpop.f32.mrb[13].mxu0 }
0x116c   :  { %v2835_v51 = vld [vmem:[%s3978_s8 + $0x60] sm:$0xff] }
0x116e   :  { %v2125_v52 = vpop.f32.mrb[28].mxu1 }
0x116f   :  { %2207 = vrot.lane.b32.xlu0 %v2125_v52, %s3348_s30  ;;  %v3079_v53 = vpop.f32.mrb[29].mxu1  ;;  %v2836_v52 = vld [vmem:[%s3978_s8 + $0x68] sm:$0xff] }
0x1170   :  { %v3244_v53 = vpack.c.bf16 %v2836_v52, %v2835_v51 }
0x1172   :  { %v2201_v54 = vpop.f32.mrb[14].mxu0 }
0x1173   :  { %2209 = vrot.lane.b32.xlu1 %v2201_v54, %s3348_s30  ;;  %v3084_v56 = vpop.f32.mrb[15].mxu0  ;;  %v2837_v54 = vld [vmem:[%s3978_s8 + $0x70] sm:$0xff] }
0x1174   :  { %v2838_v56 = vld [vmem:[%s3978_s8 + $0x78] sm:$0xff] }
0x11e1   :  { %v2208_v55 = vpop.permute.xlu0 %2207 }
0x11e2   :  { %v2213_v57 = vsel %vm410_vm7, %v1973_v47, %v2208_v55  ;;  %v3248_v55 = vpack.c.bf16 %v2838_v56, %v2837_v54 }
0x11e3   :  { %3093 = vmatprep.mubr.msk.f32.mxu1 %vm212_vm8, %v2213_v57  ;;  %v2828_v57 = vld [vmem:[%s3979_s7 + $0x1] ss:$0 sm:$0xff] }
0x11e5   :  { %v2210_v58 = vpop.permute.xlu1 %2209 }
0x11e6   :  { %v2214_v60 = vsel %vm410_vm7, %v2049_v34, %v2210_v58  ;;  %v3240_v34 = vpack.c.bf16 %v2834_v50, %v2833_v35 }
0x11e7   :  { %3094 = vmatmul.mubr.msk.f32.vlgmr.msra.gmra.mrb[30].mxu1 %vm212_vm8, %v2214_v60 }
0x11e8   :  { %3239 = vmatpush3.bf16.msra.mxu1 %v3236_v49 }
0x11e9   :  { %3241 = vmatprep.subr.bf16.mxu1 %v3240_v34 }
0x11ec   :  { %3243 = vmatpush3.bf16.msra.mxu1 %v3240_v34  ;;  %v2580_v34 = vrot.slane %v3854_v59, %v1437_v11  ;;  %v2674_v11 = vld [vmem:[%s3981_s11 + $0x10] sm:$0xff] }
0x11ed   :  { %3245 = vmatprep.subr.bf16.mxu1 %v3244_v53 }
0x11f0   :  { %3247 = vmatpush3.bf16.msra.mxu1 %v3244_v53 }
0x11f1   :  { %3249 = vmatprep.subr.bf16.mxu1 %v3248_v55 }
0x11f4   :  { %3251 = vmatpush3.bf16.msra.mxu1 %v3248_v55 }
0x12ba   :  { %v3095_v62 = vpop.f32.mrb[30].mxu1 }
0x12bb   :  { %v2302_v63 = vadd.f32 %v3095_v62, %v2223_v61  ;;  %v2296_v0 = vpop.f32.mrb[31].mxu1 }
0x12bc   :  { %v2297_v1 = vadd.f32 %v2296_v0, %v2223_v61 }
0x12bd   :  { %v2306_v3 = vadd.f32 %v2302_v63, %v3754_v25 }
0x12be   :  { %v2305_v8 = vadd.f32 %v2297_v1, %v3752_v24  ;;  %v2823_v24 = vld [vmem:[%s3977_s6 + $0x20] sm:$0xff] }
0x12bf   :  { %v2310_v2 = vsel %vm212_vm8, %v2306_v3, 0.0  ;;  %v3228_v22 = vpack.c.bf16 %v2824_v21, %v2823_v24 }
0x12c0   :  { %2311 = vadd.xlane.f32.xlu1 %v2310_v2  ;;  %v2307_v4 = vsel %vm212_vm8, %v2305_v8, 0.0 }
0x12c1   :  { %2308 = vadd.xlane.f32.xlu0 %v2307_v4  ;;  %3229 = vmatprep.subr.bf16.mxu0 %v3228_v22 }
0x12c2   :  { %3231 = vmatpush3.bf16.msra.mxu0 %v3228_v22 }
0x12c3   :  { %3233 = vmatprep.subr.bf16.mxu0 %v3232_v19 }
0x12c6   :  { %3235 = vmatpush3.bf16.msra.mxu0 %v3232_v19 }
0x12c7   :  { %3252 = vmatprep.subr.bf16.mxu0 %v3340_v9 }
0x134d   :  { %v2312_v5 = vpop.xlane.xlu1 %2311 }
0x134e   :  { %v2314_v6 = vmul.f32 0.03125, %v2312_v5  ;;  %v2309_v7 = vpop.xlane.xlu0 %2308 }
0x134f   :  { %v2313_v12 = vmul.f32 0.03125, %v2309_v7 }
0x1350   :  { %v2316_v13 = vsub.f32 %v2306_v3, %v2314_v6 }
0x1351   :  { %v2315_v16 = vsub.f32 %v2305_v8, %v2313_v12  ;;  %v2461_v12 = vrot.slane %v3854_v59, %v1317_v41  ;;  %v3259_v59 = vpack.c.bf16 %v2673_v10, %v2672_v14 }
0x1352   :  { %v2318_v20 = vmul.f32 %v2316_v13, %v2316_v13 }
0x1353   :  { %v2317_v15 = vmul.f32 %v2315_v16, %v2315_v16 }
0x1354   :  { %v2322_v25 = vsel %vm212_vm8, %v2318_v20, 0.0 }
0x1355   :  { %v2319_v17 = vsel %vm212_vm8, %v2317_v15, 0.0 }
0x1356   :  { %2320 = vadd.xlane.f32.xlu0 %v2319_v17 }
0x135a   :  { %2323 = vadd.xlane.f32.xlu0 %v2322_v25 }
0x13e3   :  { %v2321_v30 = vpop.xlane.xlu0 %2320 }
0x13e4   :  { %v2325_v32 = vmul.f32 0.03125, %v2321_v30 }
0x13e6   :  { %v2327_v37 = vadd.f32 1e-12, %v2325_v32 }
0x13e7   :  { %v2324_v38 = vpop.xlane.xlu0 %2323 }
0x13e8   :  { %3324 = vrsqrt.f32 %v2327_v37  ;;  %v2326_v33 = vmul.f32 0.03125, %v2324_v38 }
0x13ea   :  { %v2328_v39 = vadd.f32 1e-12, %v2326_v33 }
0x13ec   :  { %3326 = vrsqrt.f32 %v2328_v39  ;;  %v2590_v39 = vld [vmem:[%s3980_s10] sm:$0xff] }
0x13f2   :  { %v3325_v40 = vpop.eup %3324 }
0x13f3   :  { %v2331_v42 = vmul.f32 %v3325_v40, %v2315_v16  ;;  %v2592_v40 = vld [vmem:[%s3980_s10 + $0x10] sm:$0xff] }
0x13f5   :  { %v2337_v28 = vmul.f32 %v2336_v29, %v2331_v42 }
0x13f6   :  { %v3327_v26 = vpop.eup %3326 }
0x13f7   :  { %v2332_v44 = vmul.f32 %v3327_v26, %v2316_v13  ;;  %v2343_v45 = vadd.f32 %v2342_v43, %v2337_v28 }
0x13f9   :  { %v2338_v46 = vmul.f32 %v2336_v29, %v2332_v44  ;;  %3104 = vmatprep.mubr.msk.f32.mxu0 %vm212_vm8, %v2343_v45  ;;  %v2591_v29 = vld [vmem:[%s3980_s10 + $0x8] sm:$0xff] }
0x13fa   :  { %v3253_v42 = vpack.c.bf16 %v2591_v29, %v2590_v39 }
0x13fb   :  { %v2344_v47 = vadd.f32 %v2342_v43, %v2338_v46  ;;  %v2593_v43 = vld [vmem:[%s3980_s10 + $0x18] sm:$0xff] }
0x13fc   :  { %v3256_v28 = vpack.c.bf16 %v2593_v43, %v2592_v40 }
0x13fd   :  { %3105 = vmatmul.mubr.msk.f32.vlgmr.msra.gmra.mrb[16].mxu0 %vm212_vm8, %v2344_v47 }
0x13fe   :  { %3134 = vmatprep.mubr.msk.f32.mxu0 %vm3343_vm6, %v3341_v36  ;;  %3254 = vmatpush3.bf16.msra.mxu0 %v3253_v42 }
0x13ff   :  { %3255 = vmatprep.subr.bf16.mxu0 %v3340_v9 }
0x1402   :  { %3257 = vmatpush3.bf16.msra.mxu0 %v3256_v28 }
0x1403   :  { %3258 = vmatprep.subr.bf16.mxu0 %v3340_v9 }
0x14d0   :  { %v3106_v58 = vpop.f32.mrb[16].mxu0 }
0x14d1   :  { %v2436_v60 = vadd.f32 %v3106_v58, %v2828_v57  ;;  %v2430_v61 = vpop.f32.mrb[17].mxu0 }
0x14d2   :  { %v2431_v62 = vadd.f32 %v2828_v57, %v2430_v61 }
0x14d3   :  { %v2442_v63 = vmul.f32 0.70710677, %v2436_v60  ;;  %v2440_v5 = vmul.f32 0.5, %v2436_v60  ;;  %v2675_v60 = vld [vmem:[%s3981_s11 + $0x18] sm:$0xff] }
0x14d4   :  { %v2441_v0 = vmul.f32 0.70710677, %v2431_v62  ;;  %v2439_v2 = vmul.f32 0.5, %v2431_v62  ;;  %v3262_v61 = vpack.c.bf16 %v2675_v60, %v2674_v11 }
0x14d5   :  { %3328 = verf.f32 %v2442_v63 }
0x14d6   :  { %3330 = verf.f32 %v2441_v0 }
0x14df   :  { %v3329_v1 = vpop.eup %3328 }
0x14e0   :  { %v3331_v3 = vpop.eup %3330  ;;  %v2446_v8 = vadd.f32 1.0, %v3329_v1 }
0x14e1   :  { %v2445_v4 = vadd.f32 1.0, %v3331_v3 }
0x14e2   :  { %v2448_v7 = vmul.f32 %v2446_v8, %v2440_v5  ;;  %v2842_v8 = vld [vmem:[%s3982_s13] ss:$0 sm:$0xff] }
0x14e3   :  { %v2447_v6 = vmul.f32 %v2445_v4, %v2439_v2 }
0x14e5   :  { %3123 = vmatprep.mubr.msk.f32.mxu1 %vm1319_vm11, %v2447_v6 }
0x14e6   :  { %3124 = vmatmul.mubr.msk.f32.vlgmr.msra.gmra.mrb[32].mxu1 %vm1319_vm11, %v2448_v7 }
0x15b9   :  { %v3125_v13 = vpop.f32.mrb[32].mxu1 }
0x15ba   :  { %v2540_v16 = vadd.f32 %v3125_v13, %v2461_v12  ;;  %v2534_v15 = vpop.f32.mrb[33].mxu1 }
0x15bb   :  { %v2535_v17 = vadd.f32 %v2534_v15, %v2461_v12 }
0x15bc   :  { %v2544_v20 = vadd.f32 %v2540_v16, %v2344_v47 }
0x15bd   :  { %v2543_v25 = vadd.f32 %v2535_v17, %v2343_v45 }
0x15be   :  { %v2548_v24 = vsel %vm212_vm8, %v2544_v20, 0.0 }
0x15bf   :  { %2549 = vadd.xlane.f32.xlu1 %v2548_v24  ;;  %v2545_v21 = vsel %vm212_vm8, %v2543_v25, 0.0 }
0x15c0   :  { %2546 = vadd.xlane.f32.xlu0 %v2545_v21 }
0x164c   :  { %v2550_v22 = vpop.xlane.xlu1 %2549 }
0x164d   :  { %v2552_v23 = vmul.f32 0.03125, %v2550_v22  ;;  %v2547_v27 = vpop.xlane.xlu0 %2546 }
0x164e   :  { %v2551_v19 = vmul.f32 0.03125, %v2547_v27 }
0x164f   :  { %v2554_v30 = vsub.f32 %v2544_v20, %v2552_v23 }
0x1650   :  { %v2553_v32 = vsub.f32 %v2543_v25, %v2551_v19 }
0x1651   :  { %v2556_v37 = vmul.f32 %v2554_v30, %v2554_v30 }
0x1652   :  { %v2555_v41 = vmul.f32 %v2553_v32, %v2553_v32 }
0x1653   :  { %v2560_v38 = vsel %vm212_vm8, %v2556_v37, 0.0 }
0x1654   :  { %2561 = vadd.xlane.f32.xlu1 %v2560_v38  ;;  %v2557_v33 = vsel %vm212_vm8, %v2555_v41, 0.0 }
0x1655   :  { %2558 = vadd.xlane.f32.xlu0 %v2557_v33 }
0x16e1   :  { %v2562_v26 = vpop.xlane.xlu1 %2561 }
0x16e2   :  { %v2564_v44 = vmul.f32 0.03125, %v2562_v26  ;;  %v2559_v45 = vpop.xlane.xlu0 %2558 }
0x16e3   :  { %v2563_v46 = vmul.f32 0.03125, %v2559_v45 }
0x16e4   :  { %v2566_v47 = vadd.f32 1e-12, %v2564_v44 }
0x16e5   :  { %v2565_v18 = vadd.f32 1e-12, %v2563_v46 }
0x16e6   :  { %3332 = vrsqrt.f32 %v2566_v47 }
0x16e7   :  { %3334 = vrsqrt.f32 %v2565_v18 }
0x16f0   :  { %v3333_v49 = vpop.eup %3332 }
0x16f1   :  { %v3335_v35 = vpop.eup %3334  ;;  %v2570_v50 = vmul.f32 %v3333_v49, %v2554_v30 }
0x16f2   :  { %v2569_v51 = vmul.f32 %v3335_v35, %v2553_v32 }
0x16f3   :  { %v2576_v52 = vmul.f32 %v2574_v48, %v2570_v50 }
0x16f4   :  { %v2575_v53 = vmul.f32 %v2574_v48, %v2569_v51 }
0x16f5   :  { %v2582_v54 = vadd.f32 %v2580_v34, %v2576_v52 }
0x16f6   :  { %v2581_v56 = vadd.f32 %v2580_v34, %v2575_v53 }
0x16f7   :  { %v2585_v55 = vrot.slane %v2582_v54, 7 }
0x16f9   :  { %v2587_v57 = vsel %vm2586_vm12, %v2585_v55, %v2581_v56 }
0x16fa   :  { %v2589_v58 = vsel %vm256_vm9, %v2587_v57, 0.0 }
0x16fb   :  { %3135 = vmatmul.mubr.msk.f32.vlgmr.msra.gmra.mrb[18].mxu0 %vm212_vm8, %v2589_v58 }
0x16fc   :  { %3145 = vmatprep.mubr.msk.f32.mxu0 %vm3343_vm6, %v3341_v36  ;;  %3260 = vmatpush3.bf16.msra.mxu0 %v3259_v59  ;;  %v3338_v36 = vld [vmem:[%s3972_s12] sm:$0x7] }
0x16fd   :  { %3261 = vmatprep.subr.bf16.mxu0 %v3340_v9  ;;  %v2597_v62 = vrot.slane %v3338_v36, %v3683_v31 }
0x1700   :  { %3263 = vmatpush3.bf16.msra.mxu0 %v3262_v61 }
0x17ce   :  { %v2667_v63 = vpop.f32.mrb[18].mxu0 }
0x17cf   :  { %v2668_v0 = vadd.f32 %v2667_v63, %v2597_v62  ;;  %v3136_v1 = vpop.f32.mrb[19].mxu0 }
0x17d1   :  { %3336 = vtanh.f32 %v2668_v0 }
0x17db   :  { %v3337_v3 = vpop.eup %3336 }
0x17dc   :  { %3146 = vmatmul.mubr.msk.f32.vlgmr.msra.gmra.mrb[20].mxu0 %vm212_vm8, %v3337_v3 }
0x18af   :  { %v2752_v2 = vpop.f32.mrb[20].mxu0 }
0x18b0   :  { %v2753_v9 = vadd.f32 %v2842_v8, %v2752_v2  ;;  %v3147_v4 = vpop.f32.mrb[21].mxu0 }
0x18b2   :  { %2756 = vst [vmem:[%s3983_s14] sm:$0xff] %v2753_v9 }

</bundles_post_ra>
